<compile_context>
chip_gen: v6e
topology: v6e:2x2x1
jax: 0.10.0
libtpu: 0.0.40
codegen_flags: <defaults>
</compile_context>

<pallas_src>
import math
import numpy as np
import jax
import jax.numpy as jnp
from jax.experimental import pallas as pl
from jax.experimental.pallas import tpu as pltpu


def _round_up(x, m):
    return ((x + m - 1) // m) * m


# ------------------------------------------------------ kernel 1: per-image SimOTA assignment tensors
def _make_assign_kernel(nc):
    def _assign_kernel(gt_ref, goh_ref, raw_ref, xs_ref, ys_ref, st_ref,
                       fgm_ref, cost_ref, iou_ref):
        gt = gt_ref[...]          # (Gp, 4)  gt boxes (cx, cy, w, h); padded rows at cx=cy=-1e9
        goh = goh_ref[...]        # (Gp, nc) one-hot classes
        xs = xs_ref[...]          # (1, TA)
        ys = ys_ref[...]
        st = st_ref[...]

        # ---- decode the bbox rows inline (obj/cls logits used raw) ----
        px = (raw_ref[0:1, :] + xs) * st
        py = (raw_ref[1:2, :] + ys) * st
        pw = jnp.exp(raw_ref[2:3, :]) * st
        ph = jnp.exp(raw_ref[3:4, :]) * st

        xc = (xs + 0.5) * st
        yc = (ys + 0.5) * st
        gx, gy, gw, gh = gt[:, 0:1], gt[:, 1:2], gt[:, 2:3], gt[:, 3:4]   # (Gp, 1)

        # ---- get_in_boxes_info ----
        b_l = xc - (gx - 0.5 * gw)
        b_r = (gx + 0.5 * gw) - xc
        b_t = yc - (gy - 0.5 * gh)
        b_b = (gy + 0.5 * gh) - yc
        in_boxes = jnp.minimum(jnp.minimum(b_l, b_t), jnp.minimum(b_r, b_b)) > 0.0

        c_l = xc - (gx - 2.5 * st)
        c_r = (gx + 2.5 * st) - xc
        c_t = yc - (gy - 2.5 * st)
        c_b = (gy + 2.5 * st) - yc
        in_centers = jnp.minimum(jnp.minimum(c_l, c_t), jnp.minimum(c_r, c_b)) > 0.0

        inb_f = in_boxes.astype(jnp.float32)
        inc_f = in_centers.astype(jnp.float32)
        # per-anchor candidate fg mask (any gt: in boxes OR in centers), reduced on device
        fgm_ref[...] = jnp.max(jnp.maximum(inb_f, inc_f), axis=0, keepdims=True)   # (1, TA)

        # ---- bboxes_iou (xywh): (Gp, TA) pairwise ----
        tlx = jnp.maximum(gx - 0.5 * gw, px - 0.5 * pw)
        tly = jnp.maximum(gy - 0.5 * gh, py - 0.5 * ph)
        brx = jnp.minimum(gx + 0.5 * gw, px + 0.5 * pw)
        bry = jnp.minimum(gy + 0.5 * gh, py + 0.5 * ph)
        en = ((tlx < brx) & (tly < bry)).astype(jnp.float32)
        area_i = (brx - tlx) * (bry - tly) * en
        iou = area_i / jnp.maximum(gw * gh + pw * ph - area_i, 1e-12)
        iou_ref[...] = iou

        # ---- pairwise cls BCE cost via log-sigmoid split (no sqrt, no concat) ----
        # p = sqrt(sig(cls)*sig(obj))  =>  log p = 0.5*(logsig(cls)+logsig(obj))
        obj = raw_ref[4:5, :]                                 # (1, TA)
        cls = raw_ref[5:, :]                                  # (nc, TA)
        lsc = jnp.minimum(cls, 0.0) - jnp.log(1.0 + jnp.exp(-jnp.abs(cls)))
        lso = jnp.minimum(obj, 0.0) - jnp.log(1.0 + jnp.exp(-jnp.abs(obj)))
        lp = 0.5 * (lsc + lso)                                # (nc, TA)
        p = jnp.exp(lp)
        l1 = jnp.maximum(lp, -100.0)                          # torch BCE log clamp
        l0 = jnp.maximum(jnp.log(1.0 - p), -100.0)
        l0_sum = jnp.sum(l0, axis=0, keepdims=True)           # (1, TA)
        dlt = l1 - l0                                         # (nc, TA)
        # BCE sum over classes: cost[g,a] = -(goh[g,:]·dlt[:,a] + sum_c l0[c,a])
        if nc <= 8:
            # tiny class count: VPU broadcast-MAC beats an underfilled MXU micro-matmul
            dot = goh[:, 0:1] * dlt[0:1, :]
            for c in range(1, nc):
                dot = dot + goh[:, c:c + 1] * dlt[c:c + 1, :]
        else:
            dot = jax.lax.dot_general(
                goh.astype(jnp.bfloat16), dlt.astype(jnp.bfloat16),
                (((1,), (0,)), ((), ())), preferred_element_type=jnp.float32)
        cls_cost = -(dot + l0_sum)

        in_both = inb_f * inc_f
        cost_ref[...] = (cls_cost + 3.0 * (-jnp.log(iou + 1e-8))
                         + 100000.0 * (1.0 - in_both))
    return _assign_kernel


# ------------------------------------------------- kernel 2: masked loss reductions (sublane-dense)
def _make_loss_kernel(nc):
    def _loss_kernel(raw_ref, rt_ref, misc_ref, ct_ref, xs_ref, ys_ref, st_ref,
                     out_ref, acc_iou, acc_nwd, acc_obj, acc_cls):
        # per-anchor data arrives as (rows, TSL, 128) slabs: every row fills all 8 sublanes.
        j = pl.program_id(1)

        @pl.when(j == 0)
        def _init():
            z = jnp.zeros(acc_iou.shape, jnp.float32)
            acc_iou[...] = z
            acc_nwd[...] = z
            acc_obj[...] = z
            acc_cls[...] = z

        st = st_ref[...]                                    # (TSL, 128)
        px = (raw_ref[0] + xs_ref[...]) * st                # decode bbox inline
        py = (raw_ref[1] + ys_ref[...]) * st
        pw = jnp.exp(raw_ref[2]) * st
        ph = jnp.exp(raw_ref[3]) * st
        op = raw_ref[4]                                     # obj logit

        tx, ty, tw, th = rt_ref[0], rt_ref[1], rt_ref[2], rt_ref[3]
        datan, fg, valid = misc_ref[0], misc_ref[1], misc_ref[2]

        # ---- IOUloss(loss_type='ciou'), accumulated per-lane, masked by fg ----
        tlx = jnp.maximum(px - 0.5 * pw, tx - 0.5 * tw)
        tly = jnp.maximum(py - 0.5 * ph, ty - 0.5 * th)
        brx = jnp.minimum(px + 0.5 * pw, tx + 0.5 * tw)
        bry = jnp.minimum(py + 0.5 * ph, ty + 0.5 * th)
        en = ((tlx < brx) & (tly < bry)).astype(jnp.float32)
        area_i = (brx - tlx) * (bry - tly) * en
        area_u = pw * ph + tw * th - area_i
        iou = area_i / (area_u + 1e-16)
        cdist = (px - tx) ** 2 + (py - ty) ** 2
        ew = jnp.maximum(jnp.maximum(px + 0.5 * pw, tx + 0.5 * tw)
                         - jnp.minimum(px - 0.5 * pw, tx - 0.5 * tw), 0.0)
        eh = jnp.maximum(jnp.maximum(py + 0.5 * ph, ty + 0.5 * th)
                         - jnp.minimum(py - 0.5 * ph, ty - 0.5 * th), 0.0)
        ediag = ew * ew + eh * eh
        ciou = iou - cdist / jnp.maximum(ediag, 1e-6)
        v = (4.0 / (math.pi ** 2)) * (datan * datan)
        alpha_c = v / jnp.maximum(1.0 - iou + v, 1e-6)
        ciou = ciou - alpha_c * v
        loss_ciou = 1.0 - jnp.clip(ciou, -1.0, 1.0)
        acc_iou[...] += loss_ciou * fg

        # ---- wasserstein_loss (NWD): accumulate (1 - nwd) over fg ----
        wass = ((px - tx) ** 2 + (py - ty) ** 2 + 1e-7
                + ((pw - tw) ** 2 + (ph - th) ** 2) * 0.25)
        nwd = jnp.exp(-jnp.sqrt(wass) / 12.0)
        acc_nwd[...] += (1.0 - nwd) * fg

        # ---- sigmoid focal loss ----
        # TODO(synk): sigmoid_focal_loss is undefined in the reference source; using the
        #             torchvision definition (alpha=0.25, gamma=2, reduction='none').
        def _focal(x, t):
            soft = jnp.log(1.0 + jnp.exp(-jnp.abs(x)))
            ce = jnp.maximum(x, 0.0) - x * t + soft
            p = jnp.exp(jnp.minimum(x, 0.0) - soft)          # == sigmoid(x), reuses `soft`
            p_t = p * t + (1.0 - p) * (1.0 - t)
            a_t = 0.25 * t + 0.75 * (1.0 - t)
            return a_t * ce * (1.0 - p_t) ** 2

        acc_obj[...] += _focal(op, fg) * valid               # obj: over ALL real anchors

        cls_sum = _focal(raw_ref[5], ct_ref[0])              # cls: sum over classes, fg only
        for c in range(1, nc):
            cls_sum = cls_sum + _focal(raw_ref[5 + c], ct_ref[c])
        acc_cls[...] += cls_sum * fg

        @pl.when(j == pl.num_programs(1) - 1)
        def _fin():   # single sublane-reduce + lane-dense store per image
            out_ref[0:1, :] = jnp.sum(acc_iou[...], axis=0, keepdims=True)
            out_ref[1:2, :] = jnp.sum(acc_nwd[...], axis=0, keepdims=True)
            out_ref[2:3, :] = jnp.sum(acc_obj[...], axis=0, keepdims=True)
            out_ref[3:4, :] = jnp.sum(acc_cls[...], axis=0, keepdims=True)
    return _loss_kernel


# ---------------------------------------------------------------------------------- module wrapper
class YOLOLossPallas:
    def __init__(self, num_classes, fp16=False, strides=(8, 16, 32)):
        self.num_classes = num_classes
        self.strides = list(strides)
        self.fp16 = fp16
        # nn.Parameter alpha / beta exist in the torch module but are unused in forward().
        self.alpha = jnp.array([0.5], jnp.float32)
        self.beta = jnp.array([0.5], jnp.float32)

    def __call__(self, inputs, labels):
        nc = self.num_classes
        C = 5 + nc
        B = inputs[0].shape[0]

        # ---- glue: flatten heads channel-major (B, C, A); grids built in numpy ----
        raws, xs_l, ys_l, st_l = [], [], [], []
        for stride, o in zip(self.strides, inputs):
            _, _, h, w = o.shape
            raws.append(o.reshape(B, C, h * w).astype(jnp.float32))   # natural NCHW flatten
            yv, xv = np.meshgrid(np.arange(h), np.arange(w), indexing="ij")
            xs_l.append(xv.reshape(-1).astype(np.float32))
            ys_l.append(yv.reshape(-1).astype(np.float32))
            st_l.append(np.full((h * w,), float(stride), np.float32))
        raw = jnp.concatenate(raws, axis=2)                           # (B, C, A)
        A = raw.shape[2]
        xs_np = np.concatenate(xs_l)
        ys_np = np.concatenate(ys_l)
        st_np = np.concatenate(st_l)

        # ---- labels: (B, G, 5) = [cx, cy, w, h, class]; pad G to a multiple of 8 ----
        G = labels.shape[1]
        Gp = _round_up(max(G, 1), 8)
        labels_np = np.asarray(labels, dtype=np.float32)
        gt_boxes_np = labels_np[..., :4]
        gt_cls_np = labels_np[..., 4]

        # ---- anchor tile: one size, shared by assign (lane axis) and loss ((TSL,128) slabs).
        #      Budget ~8 MiB of double-buffered f32 blocks per step — fits every generation's
        #      scoped-VMEM default (v5e 16 MiB, v6e/v7x 32 MiB) without overrides.
        per_anchor_assign = 2 * 4 * ((C + 3) + (1 + 2 * Gp))
        per_anchor_loss = 2 * 4 * (C + 4 + 3 + nc + 3)
        budget = 8 * (1 << 20)
        t = budget // max(per_anchor_assign, per_anchor_loss)
        t = max(1024, min((t // 1024) * 1024, 8192))
        TAnch = int(min(t, _round_up(A, 1024)))               # multiple of 1024 => TSL % 8 == 0
        Apad = _round_up(A, TAnch)
        ntile = Apad // TAnch
        SA = Apad // 128
        TSL = TAnch // 128

        raw_p = jnp.pad(raw, ((0, 0), (0, 0), (0, Apad - A)))
        xs_p = jnp.asarray(np.pad(xs_np, (0, Apad - A))).reshape(1, Apad)
        ys_p = jnp.asarray(np.pad(ys_np, (0, Apad - A))).reshape(1, Apad)
        st_p = jnp.asarray(np.pad(st_np, (0, Apad - A))).reshape(1, Apad)

        gt_pad = np.zeros((B, Gp, 4), np.float32)
        gt_pad[:, :, 0:2] = -1e9                              # padded GT rows never in boxes/centers
        gt_pad[:, :G, :] = gt_boxes_np
        goh_pad = np.zeros((B, Gp, nc), np.float32)
        goh_pad[:, :G, :] = np.eye(nc, dtype=np.float32)[gt_cls_np.astype(np.int64)]

        # ---- kernel 1: per-image assignment tensors (gridded over B and A tiles) ----
        fgm_o, cost_o, iou_o = pl.pallas_call(
            _make_assign_kernel(nc),
            grid=(B, ntile),
            in_specs=[
                pl.BlockSpec((None, Gp, 4), lambda b, j: (b, 0, 0)),     # resident across j
                pl.BlockSpec((None, Gp, nc), lambda b, j: (b, 0, 0)),    # resident across j
                pl.BlockSpec((None, C, TAnch), lambda b, j: (b, 0, j)),
                pl.BlockSpec((1, TAnch), lambda b, j: (0, j)),
                pl.BlockSpec((1, TAnch), lambda b, j: (0, j)),
                pl.BlockSpec((1, TAnch), lambda b, j: (0, j)),
            ],
            out_specs=[
                pl.BlockSpec((None, 1, TAnch), lambda b, j: (b, 0, j)),
                pl.BlockSpec((None, Gp, TAnch), lambda b, j: (b, 0, j)),
                pl.BlockSpec((None, Gp, TAnch), lambda b, j: (b, 0, j)),
            ],
            out_shape=(
                jax.ShapeDtypeStruct((B, 1, Apad), jnp.float32),
                jax.ShapeDtypeStruct((B, Gp, Apad), jnp.float32),
                jax.ShapeDtypeStruct((B, Gp, Apad), jnp.float32),
            ),
            compiler_params=pltpu.CompilerParams(
                dimension_semantics=("parallel", "parallel")),
        )(jnp.asarray(gt_pad), jnp.asarray(goh_pad), raw_p, xs_p, ys_p, st_p)

        # TODO(synk): at production scale the dense f32 cost/iou device->host copy dominates
        #             wall-clock; it could be shrunk with on-device top-10 IoU sums / bf16
        #             shipping, kept f32 here for exact SimOTA tie-breaking parity with torch.
        fgm_np = np.asarray(fgm_o)[:, 0, :A] > 0.5            # (B, A)
        cost_np = np.asarray(cost_o)[:, :G, :A]               # penalty + 3*(-log iou) baked in
        iou_np = np.asarray(iou_o)[:, :G, :A]

        # ---- SimOTA dynamic-k matching (host) ----
        # TODO(synk): dynamic_k_matching / boolean-mask gathers have data-dependent shapes
        #             (torch .item(), variable top-k); this control flow stays host-side in numpy.
        reg_t_np = np.zeros((B, 4, Apad), np.float32)
        cls_t_np = np.zeros((B, nc, Apad), np.float32)
        fg_np = np.zeros((B, Apad), np.float32)
        valid_np = np.zeros((B, Apad), np.float32)
        valid_np[:, :A] = 1.0
        num_fg = 0.0
        for b in range(B):
            fg_idx = np.where(fgm_np[b])[0]
            if fg_idx.size == 0 or G == 0:
                continue
            cost = cost_np[b][:, fg_idx]                      # (G, Af)
            ious = iou_np[b][:, fg_idx]
            matching = np.zeros_like(cost)
            n_cand = min(10, ious.shape[1])
            topk = -np.sort(-ious, axis=1)[:, :n_cand]
            dynamic_ks = np.clip(topk.sum(1).astype(np.int32), 1, None)
            for g in range(G):
                pos = np.argsort(cost[g], kind="stable")[: int(dynamic_ks[g])]
                matching[g, pos] = 1.0
            amg = matching.sum(0)
            multi = amg > 1
            if multi.sum() > 0:
                cost_argmin = np.argmin(cost[:, multi], axis=0)
                matching[:, multi] = 0.0
                matching[cost_argmin, multi] = 1.0
            fg_inboxes = matching.sum(0) > 0.0
            num_fg_img = int(fg_inboxes.sum())
            num_fg += num_fg_img
            if num_fg_img == 0:
                continue
            matched_gt = matching[:, fg_inboxes].argmax(0)
            pred_ious_match = (matching * ious).sum(0)[fg_inboxes]
            anchor_ids = fg_idx[fg_inboxes]
            cls_t = (np.eye(nc, dtype=np.float32)[gt_cls_np[b][matched_gt].astype(np.int64)]
                     * pred_ious_match[:, None])              # (n_fg, nc)
            reg_t = gt_boxes_np[b][matched_gt]                # (n_fg, 4)
            cls_t_np[b][:, anchor_ids] = cls_t.T
            reg_t_np[b][:, anchor_ids] = reg_t.T
            fg_np[b, anchor_ids] = 1.0

        reg_t_j = jnp.asarray(reg_t_np)                       # (B, 4, Apad)
        cls_t_j = jnp.asarray(cls_t_np)                       # (B, nc, Apad)
        fg_j = jnp.asarray(fg_np)                             # (B, Apad)
        valid_j = jnp.asarray(valid_np)

        # TODO(synk): torch.atan (CIoU aspect term) computed in XLA glue; Mosaic atan lowering
        #             is not guaranteed — all other CIoU math stays in the kernel.
        pw_d = jnp.exp(raw_p[:, 2, :]) * st_p
        ph_d = jnp.exp(raw_p[:, 3, :]) * st_p
        datan = (jnp.arctan(pw_d / jnp.maximum(ph_d, 1e-6))
                 - jnp.arctan(reg_t_j[:, 2, :] / jnp.maximum(reg_t_j[:, 3, :], 1e-6)))
        misc = jnp.stack([datan, fg_j, valid_j], axis=1)      # (B, 3, Apad)

        # sublane-dense layout: anchor axis -> (SA, 128) slabs (free row-major reshapes)
        raw_r = raw_p.reshape(B, C, SA, 128)
        rt_r = reg_t_j.reshape(B, 4, SA, 128)
        misc_r = misc.reshape(B, 3, SA, 128)
        ct_r = cls_t_j.reshape(B, nc, SA, 128)
        xs_r = xs_p.reshape(SA, 128)
        ys_r = ys_p.reshape(SA, 128)
        st_r = st_p.reshape(SA, 128)

        # ---- kernel 2: masked loss reductions (per-image parallel, deferred XLU reduce) ----
        part = pl.pallas_call(
            _make_loss_kernel(nc),
            grid=(B, ntile),
            in_specs=[
                pl.BlockSpec((None, C, TSL, 128), lambda b, j: (b, 0, j, 0)),
                pl.BlockSpec((None, 4, TSL, 128), lambda b, j: (b, 0, j, 0)),
                pl.BlockSpec((None, 3, TSL, 128), lambda b, j: (b, 0, j, 0)),
                pl.BlockSpec((None, nc, TSL, 128), lambda b, j: (b, 0, j, 0)),
                pl.BlockSpec((TSL, 128), lambda b, j: (j, 0)),
                pl.BlockSpec((TSL, 128), lambda b, j: (j, 0)),
                pl.BlockSpec((TSL, 128), lambda b, j: (j, 0)),
            ],
            out_specs=pl.BlockSpec((None, 4, 128), lambda b, j: (b, 0, 0)),
            out_shape=jax.ShapeDtypeStruct((B, 4, 128), jnp.float32),
            scratch_shapes=[pltpu.VMEM((TSL, 128), jnp.float32) for _ in range(4)],
            compiler_params=pltpu.CompilerParams(
                dimension_semantics=("parallel", "arbitrary")),
        )(raw_r, rt_r, misc_r, ct_r, xs_r, ys_r, st_r)

        sums = jnp.sum(part, axis=(0, 2))                     # (4,): final lane/batch reduce in XLA
        loss_iou_sum = sums[0]
        nwd_sum = sums[1]
        loss_obj_sum = sums[2]
        loss_cls_sum = sums[3]

        # torch: nwd_loss = (1-nwd).mean() over fg rows (guard the empty-fg divide-by-zero),
        #        loss_iou = 0.5*nwd_loss + 0.5*ciou.sum(), total divided by max(num_fg, 1).
        nwd_den = num_fg if num_fg > 0 else 1.0
        nwd_mean = nwd_sum / nwd_den
        loss_iou_comb = 0.5 * nwd_mean + 0.5 * loss_iou_sum
        reg_weight = 5.0
        loss = (reg_weight * loss_iou_comb + loss_obj_sum + loss_cls_sum) / max(num_fg, 1.0)
        return loss


if __name__ == "__main__":
    key = jax.random.PRNGKey(0)
    B, nc, G = 2, 4, 3
    strides = [8, 16, 32]
    img = 64
    C = 5 + nc
    keys = jax.random.split(key, 8)

    # three YOLO head outputs, NCHW: (B, 9, 8, 8), (B, 9, 4, 4), (B, 9, 2, 2)
    inputs = []
    for i, s in enumerate(strides):
        h = img // s
        inputs.append(0.5 * jax.random.normal(keys[i], (B, C, h, h), dtype=jnp.float32))

    # labels: (B, G, 5) = [cx, cy, w, h, class]  in pixel coords of the 64x64 image
    cx = jax.random.uniform(keys[3], (B, G, 1), minval=8.0, maxval=56.0)
    cy = jax.random.uniform(keys[4], (B, G, 1), minval=8.0, maxval=56.0)
    ww = jax.random.uniform(keys[5], (B, G, 1), minval=6.0, maxval=24.0)
    hh = jax.random.uniform(keys[6], (B, G, 1), minval=6.0, maxval=24.0)
    cl = jax.random.randint(keys[7], (B, G, 1), 0, nc).astype(jnp.float32)
    labels = jnp.concatenate([cx, cy, ww, hh, cl], axis=-1)

    loss_mod = YOLOLossPallas(num_classes=nc, fp16=False, strides=strides)
    loss = loss_mod(inputs, labels)
    loss = jax.block_until_ready(loss)
    assert bool(jnp.isfinite(loss))
    print("KERNEL_OK")
</pallas_src>

<mosaic_0001>
module attributes {stable_mosaic.version = 11 : i64} {
  func.func @_assign_kernel(%arg0: i32, %arg1: i32, %arg2: memref<1x8x4xf32, #tpu.memory_space<vmem>>, %arg3: memref<1x8x4xf32, #tpu.memory_space<vmem>>, %arg4: memref<1x9x1024xf32, #tpu.memory_space<vmem>>, %arg5: memref<1x1024xf32, #tpu.memory_space<vmem>>, %arg6: memref<1x1024xf32, #tpu.memory_space<vmem>>, %arg7: memref<1x1024xf32, #tpu.memory_space<vmem>>, %arg8: memref<1x1x1024xf32, #tpu.memory_space<vmem>>, %arg9: memref<1x8x1024xf32, #tpu.memory_space<vmem>>, %arg10: memref<1x8x1024xf32, #tpu.memory_space<vmem>>) attributes {dimension_semantics = [#tpu.dimension_semantics<parallel>, #tpu.dimension_semantics<parallel>], iteration_bounds = array<i64: 2, 1>, scalar_prefetch = 0 : i64, scratch_operands = 0 : i64, tpu.core_type = #tpu.core_type<tc>, window_params = [{transform_indices = @transform_0, window_bounds = array<i64: 1, 8, 4>}, {transform_indices = @transform_1, window_bounds = array<i64: 1, 8, 4>}, {transform_indices = @transform_2, window_bounds = array<i64: 1, 9, 1024>}, {transform_indices = @transform_3, window_bounds = array<i64: 1, 1024>}, {transform_indices = @transform_4, window_bounds = array<i64: 1, 1024>}, {transform_indices = @transform_5, window_bounds = array<i64: 1, 1024>}, {transform_indices = @transform_6, window_bounds = array<i64: 1, 1, 1024>}, {transform_indices = @transform_7, window_bounds = array<i64: 1, 8, 1024>}, {transform_indices = @transform_8, window_bounds = array<i64: 1, 8, 1024>}]} {
    %c0 = arith.constant 0 : index
    %c0_0 = arith.constant 0 : index
    %c0_1 = arith.constant 0 : index
    %0 = vector.load %arg2[%c0, %c0_0, %c0_1] : memref<1x8x4xf32, #tpu.memory_space<vmem>>, vector<1x8x4xf32>
    %1 = vector.shape_cast %0 : vector<1x8x4xf32> to vector<8x4xf32>
    %c0_2 = arith.constant 0 : index
    %c0_3 = arith.constant 0 : index
    %c0_4 = arith.constant 0 : index
    %2 = vector.load %arg3[%c0_2, %c0_3, %c0_4] : memref<1x8x4xf32, #tpu.memory_space<vmem>>, vector<1x8x4xf32>
    %3 = vector.shape_cast %2 : vector<1x8x4xf32> to vector<8x4xf32>
    %c0_5 = arith.constant 0 : index
    %c0_6 = arith.constant 0 : index
    %4 = vector.load %arg5[%c0_5, %c0_6] : memref<1x1024xf32, #tpu.memory_space<vmem>>, vector<1x1024xf32>
    %c0_7 = arith.constant 0 : index
    %c0_8 = arith.constant 0 : index
    %5 = vector.load %arg6[%c0_7, %c0_8] : memref<1x1024xf32, #tpu.memory_space<vmem>>, vector<1x1024xf32>
    %c0_9 = arith.constant 0 : index
    %c0_10 = arith.constant 0 : index
    %6 = vector.load %arg7[%c0_9, %c0_10] : memref<1x1024xf32, #tpu.memory_space<vmem>>, vector<1x1024xf32>
    %c0_11 = arith.constant 0 : index
    %c0_12 = arith.constant 0 : index
    %c0_13 = arith.constant 0 : index
    %7 = vector.load %arg4[%c0_11, %c0_12, %c0_13] : memref<1x9x1024xf32, #tpu.memory_space<vmem>>, vector<1x1x1024xf32>
    %8 = vector.shape_cast %7 : vector<1x1x1024xf32> to vector<1x1024xf32>
    %9 = arith.addf %8, %4 : vector<1x1024xf32>
    %10 = arith.mulf %9, %6 : vector<1x1024xf32>
    %c0_14 = arith.constant 0 : index
    %c1 = arith.constant 1 : index
    %c0_15 = arith.constant 0 : index
    %11 = vector.load %arg4[%c0_14, %c1, %c0_15] : memref<1x9x1024xf32, #tpu.memory_space<vmem>>, vector<1x1x1024xf32>
    %12 = vector.shape_cast %11 : vector<1x1x1024xf32> to vector<1x1024xf32>
    %13 = arith.addf %12, %5 : vector<1x1024xf32>
    %14 = arith.mulf %13, %6 : vector<1x1024xf32>
    %c0_16 = arith.constant 0 : index
    %c2 = arith.constant 2 : index
    %c0_17 = arith.constant 0 : index
    %15 = vector.load %arg4[%c0_16, %c2, %c0_17] : memref<1x9x1024xf32, #tpu.memory_space<vmem>>, vector<1x1x1024xf32>
    %16 = vector.shape_cast %15 : vector<1x1x1024xf32> to vector<1x1024xf32>
    %17 = math.exp %16 : vector<1x1024xf32>
    %18 = arith.mulf %17, %6 : vector<1x1024xf32>
    %c0_18 = arith.constant 0 : index
    %c3 = arith.constant 3 : index
    %c0_19 = arith.constant 0 : index
    %19 = vector.load %arg4[%c0_18, %c3, %c0_19] : memref<1x9x1024xf32, #tpu.memory_space<vmem>>, vector<1x1x1024xf32>
    %20 = vector.shape_cast %19 : vector<1x1x1024xf32> to vector<1x1024xf32>
    %21 = math.exp %20 : vector<1x1024xf32>
    %22 = arith.mulf %21, %6 : vector<1x1024xf32>
    %cst = arith.constant 5.000000e-01 : f32
    %23 = vector.broadcast %cst : f32 to vector<1x1024xf32>
    %24 = arith.addf %4, %23 : vector<1x1024xf32>
    %25 = arith.mulf %24, %6 : vector<1x1024xf32>
    %cst_20 = arith.constant 5.000000e-01 : f32
    %26 = vector.broadcast %cst_20 : f32 to vector<1x1024xf32>
    %27 = arith.addf %5, %26 : vector<1x1024xf32>
    %28 = arith.mulf %27, %6 : vector<1x1024xf32>
    %29 = vector.extract_strided_slice %1 {offsets = [0, 0], sizes = [8, 1], strides = [1, 1]} : vector<8x4xf32> to vector<8x1xf32>
    %30 = vector.extract_strided_slice %1 {offsets = [0, 1], sizes = [8, 1], strides = [1, 1]} : vector<8x4xf32> to vector<8x1xf32>
    %31 = vector.extract_strided_slice %1 {offsets = [0, 2], sizes = [8, 1], strides = [1, 1]} : vector<8x4xf32> to vector<8x1xf32>
    %32 = vector.extract_strided_slice %1 {offsets = [0, 3], sizes = [8, 1], strides = [1, 1]} : vector<8x4xf32> to vector<8x1xf32>
    %cst_21 = arith.constant 5.000000e-01 : f32
    %33 = vector.broadcast %cst_21 : f32 to vector<8x1xf32>
    %34 = arith.mulf %33, %31 : vector<8x1xf32>
    %35 = arith.subf %29, %34 : vector<8x1xf32>
    %36 = vector.broadcast %25 : vector<1x1024xf32> to vector<8x1024xf32>
    %37 = vector.broadcast %35 : vector<8x1xf32> to vector<8x1024xf32>
    %38 = arith.subf %36, %37 : vector<8x1024xf32>
    %cst_22 = arith.constant 5.000000e-01 : f32
    %39 = vector.broadcast %cst_22 : f32 to vector<8x1xf32>
    %40 = arith.mulf %39, %31 : vector<8x1xf32>
    %41 = arith.addf %29, %40 : vector<8x1xf32>
    %42 = vector.broadcast %41 : vector<8x1xf32> to vector<8x1024xf32>
    %43 = vector.broadcast %25 : vector<1x1024xf32> to vector<8x1024xf32>
    %44 = arith.subf %42, %43 : vector<8x1024xf32>
    %cst_23 = arith.constant 5.000000e-01 : f32
    %45 = vector.broadcast %cst_23 : f32 to vector<8x1xf32>
    %46 = arith.mulf %45, %32 : vector<8x1xf32>
    %47 = arith.subf %30, %46 : vector<8x1xf32>
    %48 = vector.broadcast %28 : vector<1x1024xf32> to vector<8x1024xf32>
    %49 = vector.broadcast %47 : vector<8x1xf32> to vector<8x1024xf32>
    %50 = arith.subf %48, %49 : vector<8x1024xf32>
    %cst_24 = arith.constant 5.000000e-01 : f32
    %51 = vector.broadcast %cst_24 : f32 to vector<8x1xf32>
    %52 = arith.mulf %51, %32 : vector<8x1xf32>
    %53 = arith.addf %30, %52 : vector<8x1xf32>
    %54 = vector.broadcast %53 : vector<8x1xf32> to vector<8x1024xf32>
    %55 = vector.broadcast %28 : vector<1x1024xf32> to vector<8x1024xf32>
    %56 = arith.subf %54, %55 : vector<8x1024xf32>
    %57 = arith.minimumf %38, %50 : vector<8x1024xf32>
    %58 = arith.minimumf %44, %56 : vector<8x1024xf32>
    %59 = arith.minimumf %57, %58 : vector<8x1024xf32>
    %cst_25 = arith.constant 0.000000e+00 : f32
    %60 = vector.broadcast %cst_25 : f32 to vector<8x1024xf32>
    %61 = arith.cmpf ogt, %59, %60 : vector<8x1024xf32>
    %cst_26 = arith.constant 2.500000e+00 : f32
    %62 = vector.broadcast %cst_26 : f32 to vector<1x1024xf32>
    %63 = arith.mulf %62, %6 : vector<1x1024xf32>
    %64 = vector.broadcast %29 : vector<8x1xf32> to vector<8x1024xf32>
    %65 = vector.broadcast %63 : vector<1x1024xf32> to vector<8x1024xf32>
    %66 = arith.subf %64, %65 : vector<8x1024xf32>
    %67 = vector.broadcast %25 : vector<1x1024xf32> to vector<8x1024xf32>
    %68 = arith.subf %67, %66 : vector<8x1024xf32>
    %cst_27 = arith.constant 2.500000e+00 : f32
    %69 = vector.broadcast %cst_27 : f32 to vector<1x1024xf32>
    %70 = arith.mulf %69, %6 : vector<1x1024xf32>
    %71 = vector.broadcast %29 : vector<8x1xf32> to vector<8x1024xf32>
    %72 = vector.broadcast %70 : vector<1x1024xf32> to vector<8x1024xf32>
    %73 = arith.addf %71, %72 : vector<8x1024xf32>
    %74 = vector.broadcast %25 : vector<1x1024xf32> to vector<8x1024xf32>
    %75 = arith.subf %73, %74 : vector<8x1024xf32>
    %cst_28 = arith.constant 2.500000e+00 : f32
    %76 = vector.broadcast %cst_28 : f32 to vector<1x1024xf32>
    %77 = arith.mulf %76, %6 : vector<1x1024xf32>
    %78 = vector.broadcast %30 : vector<8x1xf32> to vector<8x1024xf32>
    %79 = vector.broadcast %77 : vector<1x1024xf32> to vector<8x1024xf32>
    %80 = arith.subf %78, %79 : vector<8x1024xf32>
    %81 = vector.broadcast %28 : vector<1x1024xf32> to vector<8x1024xf32>
    %82 = arith.subf %81, %80 : vector<8x1024xf32>
    %cst_29 = arith.constant 2.500000e+00 : f32
    %83 = vector.broadcast %cst_29 : f32 to vector<1x1024xf32>
    %84 = arith.mulf %83, %6 : vector<1x1024xf32>
    %85 = vector.broadcast %30 : vector<8x1xf32> to vector<8x1024xf32>
    %86 = vector.broadcast %84 : vector<1x1024xf32> to vector<8x1024xf32>
    %87 = arith.addf %85, %86 : vector<8x1024xf32>
    %88 = vector.broadcast %28 : vector<1x1024xf32> to vector<8x1024xf32>
    %89 = arith.subf %87, %88 : vector<8x1024xf32>
    %90 = arith.minimumf %68, %82 : vector<8x1024xf32>
    %91 = arith.minimumf %75, %89 : vector<8x1024xf32>
    %92 = arith.minimumf %90, %91 : vector<8x1024xf32>
    %cst_30 = arith.constant 0.000000e+00 : f32
    %93 = vector.broadcast %cst_30 : f32 to vector<8x1024xf32>
    %94 = arith.cmpf ogt, %92, %93 : vector<8x1024xf32>
    %95 = arith.extui %61 : vector<8x1024xi1> to vector<8x1024xi32>
    %96 = arith.sitofp %95 : vector<8x1024xi32> to vector<8x1024xf32>
    %97 = arith.extui %94 : vector<8x1024xi1> to vector<8x1024xi32>
    %98 = arith.sitofp %97 : vector<8x1024xi32> to vector<8x1024xf32>
    %99 = arith.maximumf %96, %98 : vector<8x1024xf32>
    %cst_31 = arith.constant dense<0xFF800000> : vector<1024xf32>
    %100 = vector.multi_reduction <maximumf>, %99, %cst_31 [0] : vector<8x1024xf32> to vector<1024xf32>
    %101 = vector.shape_cast %100 : vector<1024xf32> to vector<1x1024xf32>
    %c0_32 = arith.constant 0 : index
    %c0_33 = arith.constant 0 : index
    %c0_34 = arith.constant 0 : index
    %102 = vector.load %arg8[%c0_32, %c0_33, %c0_34] : memref<1x1x1024xf32, #tpu.memory_space<vmem>>, vector<1x1x1024xf32>
    %103 = vector.shape_cast %102 : vector<1x1x1024xf32> to vector<1x1024xf32>
    %104 = vector.shape_cast %101 : vector<1x1024xf32> to vector<1x1x1024xf32>
    tpu.vector_store %arg8[%c0_32, %c0_33, %c0_34], %104 {strides = array<i32>} : memref<1x1x1024xf32, #tpu.memory_space<vmem>>, vector<1x1x1024xf32>,
    %cst_35 = arith.constant 5.000000e-01 : f32
    %105 = vector.broadcast %cst_35 : f32 to vector<8x1xf32>
    %106 = arith.mulf %105, %31 : vector<8x1xf32>
    %107 = arith.subf %29, %106 : vector<8x1xf32>
    %cst_36 = arith.constant 5.000000e-01 : f32
    %108 = vector.broadcast %cst_36 : f32 to vector<1x1024xf32>
    %109 = arith.mulf %108, %18 : vector<1x1024xf32>
    %110 = arith.subf %10, %109 : vector<1x1024xf32>
    %111 = vector.broadcast %107 : vector<8x1xf32> to vector<8x1024xf32>
    %112 = vector.broadcast %110 : vector<1x1024xf32> to vector<8x1024xf32>
    %113 = arith.maximumf %111, %112 : vector<8x1024xf32>
    %cst_37 = arith.constant 5.000000e-01 : f32
    %114 = vector.broadcast %cst_37 : f32 to vector<8x1xf32>
    %115 = arith.mulf %114, %32 : vector<8x1xf32>
    %116 = arith.subf %30, %115 : vector<8x1xf32>
    %cst_38 = arith.constant 5.000000e-01 : f32
    %117 = vector.broadcast %cst_38 : f32 to vector<1x1024xf32>
    %118 = arith.mulf %117, %22 : vector<1x1024xf32>
    %119 = arith.subf %14, %118 : vector<1x1024xf32>
    %120 = vector.broadcast %116 : vector<8x1xf32> to vector<8x1024xf32>
    %121 = vector.broadcast %119 : vector<1x1024xf32> to vector<8x1024xf32>
    %122 = arith.maximumf %120, %121 : vector<8x1024xf32>
    %cst_39 = arith.constant 5.000000e-01 : f32
    %123 = vector.broadcast %cst_39 : f32 to vector<8x1xf32>
    %124 = arith.mulf %123, %31 : vector<8x1xf32>
    %125 = arith.addf %29, %124 : vector<8x1xf32>
    %cst_40 = arith.constant 5.000000e-01 : f32
    %126 = vector.broadcast %cst_40 : f32 to vector<1x1024xf32>
    %127 = arith.mulf %126, %18 : vector<1x1024xf32>
    %128 = arith.addf %10, %127 : vector<1x1024xf32>
    %129 = vector.broadcast %125 : vector<8x1xf32> to vector<8x1024xf32>
    %130 = vector.broadcast %128 : vector<1x1024xf32> to vector<8x1024xf32>
    %131 = arith.minimumf %129, %130 : vector<8x1024xf32>
    %cst_41 = arith.constant 5.000000e-01 : f32
    %132 = vector.broadcast %cst_41 : f32 to vector<8x1xf32>
    %133 = arith.mulf %132, %32 : vector<8x1xf32>
    %134 = arith.addf %30, %133 : vector<8x1xf32>
    %cst_42 = arith.constant 5.000000e-01 : f32
    %135 = vector.broadcast %cst_42 : f32 to vector<1x1024xf32>
    %136 = arith.mulf %135, %22 : vector<1x1024xf32>
    %137 = arith.addf %14, %136 : vector<1x1024xf32>
    %138 = vector.broadcast %134 : vector<8x1xf32> to vector<8x1024xf32>
    %139 = vector.broadcast %137 : vector<1x1024xf32> to vector<8x1024xf32>
    %140 = arith.minimumf %138, %139 : vector<8x1024xf32>
    %141 = arith.cmpf olt, %113, %131 : vector<8x1024xf32>
    %142 = arith.cmpf olt, %122, %140 : vector<8x1024xf32>
    %143 = arith.andi %141, %142 : vector<8x1024xi1>
    %144 = arith.extui %143 : vector<8x1024xi1> to vector<8x1024xi32>
    %145 = arith.sitofp %144 : vector<8x1024xi32> to vector<8x1024xf32>
    %146 = arith.subf %131, %113 : vector<8x1024xf32>
    %147 = arith.subf %140, %122 : vector<8x1024xf32>
    %148 = arith.mulf %146, %147 : vector<8x1024xf32>
    %149 = arith.mulf %148, %145 : vector<8x1024xf32>
    %150 = arith.mulf %31, %32 : vector<8x1xf32>
    %151 = arith.mulf %18, %22 : vector<1x1024xf32>
    %152 = vector.broadcast %150 : vector<8x1xf32> to vector<8x1024xf32>
    %153 = vector.broadcast %151 : vector<1x1024xf32> to vector<8x1024xf32>
    %154 = arith.addf %152, %153 : vector<8x1024xf32>
    %155 = arith.subf %154, %149 : vector<8x1024xf32>
    %cst_43 = arith.constant 9.99999996E-13 : f32
    %156 = vector.broadcast %cst_43 : f32 to vector<8x1024xf32>
    %157 = arith.maximumf %155, %156 : vector<8x1024xf32>
    %158 = arith.divf %149, %157 : vector<8x1024xf32>
    %c0_44 = arith.constant 0 : index
    %c0_45 = arith.constant 0 : index
    %c0_46 = arith.constant 0 : index
    %159 = vector.load %arg10[%c0_44, %c0_45, %c0_46] : memref<1x8x1024xf32, #tpu.memory_space<vmem>>, vector<1x8x1024xf32>
    %160 = vector.shape_cast %159 : vector<1x8x1024xf32> to vector<8x1024xf32>
    %161 = vector.shape_cast %158 : vector<8x1024xf32> to vector<1x8x1024xf32>
    tpu.vector_store %arg10[%c0_44, %c0_45, %c0_46], %161 {strides = array<i32>} : memref<1x8x1024xf32, #tpu.memory_space<vmem>>, vector<1x8x1024xf32>,
    %c0_47 = arith.constant 0 : index
    %c4 = arith.constant 4 : index
    %c0_48 = arith.constant 0 : index
    %162 = vector.load %arg4[%c0_47, %c4, %c0_48] : memref<1x9x1024xf32, #tpu.memory_space<vmem>>, vector<1x1x1024xf32>
    %163 = vector.shape_cast %162 : vector<1x1x1024xf32> to vector<1x1024xf32>
    %c0_49 = arith.constant 0 : index
    %c5 = arith.constant 5 : index
    %c0_50 = arith.constant 0 : index
    %164 = vector.load %arg4[%c0_49, %c5, %c0_50] : memref<1x9x1024xf32, #tpu.memory_space<vmem>>, vector<1x4x1024xf32>
    %165 = vector.shape_cast %164 : vector<1x4x1024xf32> to vector<4x1024xf32>
    %cst_51 = arith.constant 0.000000e+00 : f32
    %166 = vector.broadcast %cst_51 : f32 to vector<4x1024xf32>
    %167 = arith.minimumf %165, %166 : vector<4x1024xf32>
    %168 = math.absf %165 : vector<4x1024xf32>
    %cst_52 = arith.constant 0.000000e+00 : f32
    %169 = vector.broadcast %cst_52 : f32 to vector<4x1024xf32>
    %170 = arith.subf %169, %168 : vector<4x1024xf32>
    %171 = math.exp %170 : vector<4x1024xf32>
    %cst_53 = arith.constant 1.000000e+00 : f32
    %172 = vector.broadcast %cst_53 : f32 to vector<4x1024xf32>
    %173 = arith.addf %172, %171 : vector<4x1024xf32>
    %174 = math.log %173 : vector<4x1024xf32>
    %175 = arith.subf %167, %174 : vector<4x1024xf32>
    %cst_54 = arith.constant 0.000000e+00 : f32
    %176 = vector.broadcast %cst_54 : f32 to vector<1x1024xf32>
    %177 = arith.minimumf %163, %176 : vector<1x1024xf32>
    %178 = math.absf %163 : vector<1x1024xf32>
    %cst_55 = arith.constant 0.000000e+00 : f32
    %179 = vector.broadcast %cst_55 : f32 to vector<1x1024xf32>
    %180 = arith.subf %179, %178 : vector<1x1024xf32>
    %181 = math.exp %180 : vector<1x1024xf32>
    %cst_56 = arith.constant 1.000000e+00 : f32
    %182 = vector.broadcast %cst_56 : f32 to vector<1x1024xf32>
    %183 = arith.addf %182, %181 : vector<1x1024xf32>
    %184 = math.log %183 : vector<1x1024xf32>
    %185 = arith.subf %177, %184 : vector<1x1024xf32>
    %186 = vector.broadcast %185 : vector<1x1024xf32> to vector<4x1024xf32>
    %187 = arith.addf %175, %186 : vector<4x1024xf32>
    %cst_57 = arith.constant 5.000000e-01 : f32
    %188 = vector.broadcast %cst_57 : f32 to vector<4x1024xf32>
    %189 = arith.mulf %188, %187 : vector<4x1024xf32>
    %190 = math.exp %189 : vector<4x1024xf32>
    %cst_58 = arith.constant -1.000000e+02 : f32
    %191 = vector.broadcast %cst_58 : f32 to vector<4x1024xf32>
    %192 = arith.maximumf %189, %191 : vector<4x1024xf32>
    %cst_59 = arith.constant 1.000000e+00 : f32
    %193 = vector.broadcast %cst_59 : f32 to vector<4x1024xf32>
    %194 = arith.subf %193, %190 : vector<4x1024xf32>
    %195 = math.log %194 : vector<4x1024xf32>
    %cst_60 = arith.constant -1.000000e+02 : f32
    %196 = vector.broadcast %cst_60 : f32 to vector<4x1024xf32>
    %197 = arith.maximumf %195, %196 : vector<4x1024xf32>
    %cst_61 = arith.constant dense<0.000000e+00> : vector<1024xf32>
    %198 = vector.multi_reduction <add>, %197, %cst_61 [0] : vector<4x1024xf32> to vector<1024xf32>
    %199 = vector.shape_cast %198 : vector<1024xf32> to vector<1x1024xf32>
    %200 = arith.subf %192, %197 : vector<4x1024xf32>
    %201 = vector.extract_strided_slice %3 {offsets = [0, 0], sizes = [8, 1], strides = [1, 1]} : vector<8x4xf32> to vector<8x1xf32>
    %202 = vector.extract_strided_slice %200 {offsets = [0, 0], sizes = [1, 1024], strides = [1, 1]} : vector<4x1024xf32> to vector<1x1024xf32>
    %203 = vector.broadcast %201 : vector<8x1xf32> to vector<8x1024xf32>
    %204 = vector.broadcast %202 : vector<1x1024xf32> to vector<8x1024xf32>
    %205 = arith.mulf %203, %204 : vector<8x1024xf32>
    %206 = vector.extract_strided_slice %3 {offsets = [0, 1], sizes = [8, 1], strides = [1, 1]} : vector<8x4xf32> to vector<8x1xf32>
    %207 = vector.extract_strided_slice %200 {offsets = [1, 0], sizes = [1, 1024], strides = [1, 1]} : vector<4x1024xf32> to vector<1x1024xf32>
    %208 = vector.broadcast %206 : vector<8x1xf32> to vector<8x1024xf32>
    %209 = vector.broadcast %207 : vector<1x1024xf32> to vector<8x1024xf32>
    %210 = arith.mulf %208, %209 : vector<8x1024xf32>
    %211 = arith.addf %205, %210 : vector<8x1024xf32>
    %212 = vector.extract_strided_slice %3 {offsets = [0, 2], sizes = [8, 1], strides = [1, 1]} : vector<8x4xf32> to vector<8x1xf32>
    %213 = vector.extract_strided_slice %200 {offsets = [2, 0], sizes = [1, 1024], strides = [1, 1]} : vector<4x1024xf32> to vector<1x1024xf32>
    %214 = vector.broadcast %212 : vector<8x1xf32> to vector<8x1024xf32>
    %215 = vector.broadcast %213 : vector<1x1024xf32> to vector<8x1024xf32>
    %216 = arith.mulf %214, %215 : vector<8x1024xf32>
    %217 = arith.addf %211, %216 : vector<8x1024xf32>
    %218 = vector.extract_strided_slice %3 {offsets = [0, 3], sizes = [8, 1], strides = [1, 1]} : vector<8x4xf32> to vector<8x1xf32>
    %219 = vector.extract_strided_slice %200 {offsets = [3, 0], sizes = [1, 1024], strides = [1, 1]} : vector<4x1024xf32> to vector<1x1024xf32>
    %220 = vector.broadcast %218 : vector<8x1xf32> to vector<8x1024xf32>
    %221 = vector.broadcast %219 : vector<1x1024xf32> to vector<8x1024xf32>
    %222 = arith.mulf %220, %221 : vector<8x1024xf32>
    %223 = arith.addf %217, %222 : vector<8x1024xf32>
    %224 = vector.broadcast %199 : vector<1x1024xf32> to vector<8x1024xf32>
    %225 = arith.addf %223, %224 : vector<8x1024xf32>
    %cst_62 = arith.constant 0.000000e+00 : f32
    %226 = vector.broadcast %cst_62 : f32 to vector<8x1024xf32>
    %227 = arith.subf %226, %225 : vector<8x1024xf32>
    %228 = arith.mulf %96, %98 : vector<8x1024xf32>
    %cst_63 = arith.constant 9.99999993E-9 : f32
    %229 = vector.broadcast %cst_63 : f32 to vector<8x1024xf32>
    %230 = arith.addf %158, %229 : vector<8x1024xf32>
    %231 = math.log %230 : vector<8x1024xf32>
    %cst_64 = arith.constant 0.000000e+00 : f32
    %232 = vector.broadcast %cst_64 : f32 to vector<8x1024xf32>
    %233 = arith.subf %232, %231 : vector<8x1024xf32>
    %cst_65 = arith.constant 3.000000e+00 : f32
    %234 = vector.broadcast %cst_65 : f32 to vector<8x1024xf32>
    %235 = arith.mulf %234, %233 : vector<8x1024xf32>
    %236 = arith.addf %227, %235 : vector<8x1024xf32>
    %cst_66 = arith.constant 1.000000e+00 : f32
    %237 = vector.broadcast %cst_66 : f32 to vector<8x1024xf32>
    %238 = arith.subf %237, %228 : vector<8x1024xf32>
    %cst_67 = arith.constant 1.000000e+05 : f32
    %239 = vector.broadcast %cst_67 : f32 to vector<8x1024xf32>
    %240 = arith.mulf %239, %238 : vector<8x1024xf32>
    %241 = arith.addf %236, %240 : vector<8x1024xf32>
    %c0_68 = arith.constant 0 : index
    %c0_69 = arith.constant 0 : index
    %c0_70 = arith.constant 0 : index
    %242 = vector.load %arg9[%c0_68, %c0_69, %c0_70] : memref<1x8x1024xf32, #tpu.memory_space<vmem>>, vector<1x8x1024xf32>
    %243 = vector.shape_cast %242 : vector<1x8x1024xf32> to vector<8x1024xf32>
    %244 = vector.shape_cast %241 : vector<8x1024xf32> to vector<1x8x1024xf32>
    tpu.vector_store %arg9[%c0_68, %c0_69, %c0_70], %244 {strides = array<i32>} : memref<1x8x1024xf32, #tpu.memory_space<vmem>>, vector<1x8x1024xf32>,
    return
  }
  func.func @transform_0(%arg0: i32, %arg1: i32) -> (i32, i32, i32) {
    %c0_i32 = arith.constant 0 : i32
    %c0_i32_0 = arith.constant 0 : i32
    %c0_i32_1 = arith.constant 0 : i32
    return %arg0, %c0_i32, %c0_i32_0 : i32, i32, i32
  }
  func.func @transform_1(%arg0: i32, %arg1: i32) -> (i32, i32, i32) {
    %c0_i32 = arith.constant 0 : i32
    %c0_i32_0 = arith.constant 0 : i32
    %c0_i32_1 = arith.constant 0 : i32
    return %arg0, %c0_i32, %c0_i32_0 : i32, i32, i32
  }
  func.func @transform_2(%arg0: i32, %arg1: i32) -> (i32, i32, i32) {
    %c0_i32 = arith.constant 0 : i32
    %c0_i32_0 = arith.constant 0 : i32
    return %arg0, %c0_i32, %arg1 : i32, i32, i32
  }
  func.func @transform_3(%arg0: i32, %arg1: i32) -> (i32, i32) {
    %c0_i32 = arith.constant 0 : i32
    %c0_i32_0 = arith.constant 0 : i32
    return %c0_i32, %arg1 : i32, i32
  }
  func.func @transform_4(%arg0: i32, %arg1: i32) -> (i32, i32) {
    %c0_i32 = arith.constant 0 : i32
    %c0_i32_0 = arith.constant 0 : i32
    return %c0_i32, %arg1 : i32, i32
  }
  func.func @transform_5(%arg0: i32, %arg1: i32) -> (i32, i32) {
    %c0_i32 = arith.constant 0 : i32
    %c0_i32_0 = arith.constant 0 : i32
    return %c0_i32, %arg1 : i32, i32
  }
  func.func @transform_6(%arg0: i32, %arg1: i32) -> (i32, i32, i32) {
    %c0_i32 = arith.constant 0 : i32
    %c0_i32_0 = arith.constant 0 : i32
    return %arg0, %c0_i32, %arg1 : i32, i32, i32
  }
  func.func @transform_7(%arg0: i32, %arg1: i32) -> (i32, i32, i32) {
    %c0_i32 = arith.constant 0 : i32
    %c0_i32_0 = arith.constant 0 : i32
    return %arg0, %c0_i32, %arg1 : i32, i32, i32
  }
  func.func @transform_8(%arg0: i32, %arg1: i32) -> (i32, i32, i32) {
    %c0_i32 = arith.constant 0 : i32
    %c0_i32_0 = arith.constant 0 : i32
    return %arg0, %c0_i32, %arg1 : i32, i32, i32
  }
}

</mosaic_0001>

<bundles_post_ra>
// kernel: tpu_custom_call.1
= control target key start
LH: loop header
LB: loop body
LE: loop exit
PB: predicated region body
PF: predicated region fallthrough
CT: control target
= control target key end

     0   :  { %s4815_s0 = inlined_call_operand.vmem [shape: f32[2,8,4], index: 0, kind: input, shape index: {}]   ;;  %s4816_s1 = inlined_call_operand.vmem [shape: f32[2,8,4], index: 1, kind: input, shape index: {}]   ;;  %s4817_s2 = inlined_call_operand.vmem [shape: f32[2,9,1024], index: 2, kind: input, shape index: {}]   ;;  %s4818_s3 = inlined_call_operand.vmem [shape: f32[1,1024], index: 3, kind: input, shape index: {}]   ;;  %s4819_s4 = inlined_call_operand.vmem [shape: f32[1,1024], index: 4, kind: input, shape index: {}]   ;;  %s4820_s5 = inlined_call_operand.vmem [shape: f32[1,1024], index: 5, kind: input, shape index: {}]   ;;  %s4821_s6 = inlined_call_operand.hbm [shape: f32[2,1,1024], index: 6, kind: output, shape index: {0}]   ;;  %s4822_s7 = inlined_call_operand.hbm [shape: f32[2,8,1024], index: 7, kind: output, shape index: {1}]   ;;  %s4823_s8 = inlined_call_operand.hbm [shape: f32[2,8,1024], index: 8, kind: output, shape index: {2}]  }
   0x1   :  { %4909 = sst [smem:[#allocation76_spill]] %s4815_s0 }
   0x2   :  { %4910 = sst [smem:[#allocation77_spill]] %s4816_s1 }
   0x3   :  { %4911 = sst [smem:[#allocation78_spill]] %s4817_s2 }
   0x4   :  { %14 = vsyncpa [#allocation3], 0 }
   0x5   :  { %16 = vsyncpa [#allocation3 + $0x1], 0 }
   0x6   :  { %17 = vsyncpa [#allocation5], 0 }
   0x7   :  { %19 = vsyncpa [#allocation5 + $0x1], 0  ;;  %s2873_s27 = smov 0   ;;  %s2875_s28 = smov 0  }
   0x8   :  { %s2877_s29 = smov 0   ;;  %s2879_s30 = smov 0  }
   0x9   :  { %s2881_s9 = smov 0   ;;  %s2883_s10 = smov 0  }
   0xa LB: > { %s2369_s11 = sadd.s32 4294967295, %s2815_s10   ;;  %s4824_s12 = sadd.s32 4294967294, %s2815_s10   ;;  %s2815_s10 = sphi %s2883_s10, %s25_s10   ;;  %s2811_s9 = sphi %s2881_s9, %s5277_s9   ;;  %s2807_s30 = sphi %s2879_s30, %s5276_s30   ;;  %s2803_s29 = sphi %s2877_s29, %s5275_s29   ;;  %s2799_s28 = sphi %s2875_s28, %s5274_s28   ;;  %s2795_s27 = sphi %s2873_s27, %s5273_s27  }
   0xb   : > { %s37_s13 = sadd.s32 1, %s2811_s9  ;;  %s204_s14 = sadd.s32 1, %s2803_s29 }
   0xc   : > { %p39_p0 = scmp.ge.s32.totalorder %s37_s13, 2  ;;  %p214_p1 = scmp.ne.s32.totalorder %s2803_s29, %s2799_s28 }
   0xd   : > { %p215_p2 = scmp.eq.s32.totalorder %s2369_s11, 1  ;;  %p220_p3 = scmp.ne.s32.totalorder %s2799_s28, %s2795_s27 }
   0xe   : > { %s5279_s13 = smov (%p39_p0, %s37_s13), 0  ;;  %p221_p5 = scmp.eq.s32.totalorder %s4824_s12, 1 }
   0xf   : > { %p2915_p4 = por %p215_p2, %p214_p1  ;;  %s199_s16 = ssub.s32 %s2811_s9, %s5279_s13 }
  0x10   : > { %p2376_p6 = scmp.ge.s32.totalorder %s2815_s10, 1  ;;  %p202_p7 = scmp.eq.s32.totalorder %s199_s16, 0 }
  0x11   : > { %p2924_p8 = por %p221_p5, %p220_p3  ;;  %p346_p9 = scmp.lt.s32.totalorder %s2815_s10, 3 }
  0x12   : > { %s2930_s18 = scalar_select %p202_p7, %s2803_s29, %s204_s14  }
  0x13   : > { %p347_p10 = pnand %p2376_p6, %p346_p9 }
  0x15   : > { %350 = sbr.rel (%p347_p10) target bundleno = 518 (0x206), region = 44 }
  0x1a   : > { %p414_p11 = scmp.lt.s32.totalorder %s2807_s30, 1  ;;  %v2817_v0 = vmov 1   ;;  %v2818_v1 = vmov 0   ;;  %s4914_s0 = sld [smem:[#allocation76_spill]]  ;;  %v2972_v12 = vld [vmem:[%s4818_s3] sm:$0xff]  ;;  %v491_v42 = vlaneseq }
  0x1b   : > { %2505 = vset.pattern.permute.xlu0 %v2817_v0  ;;  %2504 = vset.pattern.permute.xlu1 %v2818_v1  ;;  %s2819_s24 = smov 126   ;;  %s2820_s25 = smov 127   ;;  %v2977_v13 = vld [vmem:[%s4819_s4] sm:$0xff]  ;;  %v480_v16 = vadd.f32 0.5, %v2972_v12 }
  0x1c   : > { %s2936_s19 = scalar_select %p414_p11, %s2807_s30, 1  ;;  %v482_v17 = vadd.f32 0.5, %v2977_v13  ;;  %v2991_v20 = vld [vmem:[%s4820_s5] sm:$0xff]  ;;  %v3016_v50 = vshrl.u32 %v491_v42, 7 }
  0x1d   : > { %s4915_s2 = sld [smem:[#allocation78_spill]]  ;;  %v2998_v24 = vmul.f32 %v480_v16, %v2991_v20  ;;  %v2822_v16 = vmov 3   ;;  %s4667_s22 = sand.u32 1, %s2369_s11  }
  0x1e   : > { %s2380_s20 = sshll.u32 %s2936_s19, 3  ;;  %s2427_s26 = sshll.u32 %s2936_s19, 7  ;;  %v3001_v25 = vmul.f32 %v482_v17, %v2991_v20  ;;  %4916 = vst [vmem:[#allocation9_spill] sm:$0xff] %v3016_v50  ;;  %v3026_v54 = vsub.s32 1, %v3016_v50  ;;  %v3037_v58 = vsub.s32 2, %v3016_v50  ;;  %v3042_v60 = vsub.s32 3, %v3016_v50 }
  0x1f   : > { %s4917_s1 = sld [smem:[#allocation77_spill]]  ;;  %v3045_v61 = vsub.s32 4, %v3016_v50  ;;  %s2824_s14 = smov [#allocation4]  }
  0x20   : > { %s417_s23 = scalar_lea.vmem %s4914_s0, %s2380_s20  ;;  %v3031_v56 = vrot.slane %v2998_v24, %v3026_v54  ;;  %v3049_v63 = vrot.slane %v2998_v24, %v3037_v58 }
  0x21   : > { %v2944_v2 = vld [vmem:[%s417_s23] sm:$0xff]  ;;  %s2429_s23 = sshll.u32 %s2807_s30, 10 }
  0x22   : > { %v484_v3 = vmul.f32 0.5, %v2944_v2  ;;  %4918 = vst [vmem:[#allocation10_spill] sm:$0xff] %v3031_v56  ;;  %4919 = vst [vmem:[#allocation11_spill] sm:$0xff] %v3049_v63  ;;  %s4676_s16 = scalar_lea.hbm %s4822_s7, %s2429_s23 }
  0x23   : > { %s2952_s12 = scalar_lea.vmem %s4915_s2, %s2427_s26 }
  0x24   : > { %486 = vrot.lane.b32.xlu0 %v484_v3, %s2819_s24  ;;  %v2414_v4 = vld [vmem:[%s2952_s12 + $0x4] ss:$8 sm:$0xf]  ;;  %v2959_v7 = vld [vmem:[%s2952_s12] sm:$0xe0] }
  0x25   : > { %v2415_v5 = vld [vmem:[%s2952_s12 + $0x4] ss:$8 sm:$0xf0]  ;;  %v2962_v8 = vld [vmem:[%s2952_s12 + $0x8] sm:$0xe0]  ;;  %s421_s21 = scalar_lea.vmem %s4917_s1, %s2380_s20 }
  0x26   : > { %v2956_v6 = vor.u32 %v2415_v5, %v2414_v4  ;;  %v1358_v10 = vand.u32 2147483647, %v2959_v7  ;;  %v2967_v11 = vld [vmem:[%s2952_s12 + $0x10] sm:$0xe0]  ;;  %v2980_v14 = vld [vmem:[%s2952_s12 + $0x18] sm:$0xe0]  ;;  %v3053_v4 = vrot.slane %v2998_v24, %v3042_v60  ;;  %v3057_v5 = vrot.slane %v2998_v24, %v3045_v61 }
  0x27   : > { %v1359_v15 = vand.u32 2147483647, %v2962_v8  ;;  %v2986_v18 = vld [vmem:[%s2952_s12 + $0x20] sm:$0xe0]  ;;  %v2994_v21 = vld [vmem:[%s2952_s12 + $0x28] sm:$0xe0] }
  0x28   : > { %1223 = vrot.lane.b32.xlu0 %v2944_v2, %s2820_s25  ;;  %v1487_v9 = vand.u32 2147483647, %v2956_v6  ;;  %v1360_v22 = vand.u32 2147483647, %v2967_v11  ;;  %v1374_v23 = vsub.f32 0.0, %v1358_v10  ;;  %v3033_v57 = vld [vmem:[%s421_s21] sm:$0xff] }
  0x29   : > { %v3004_v26 = vld [vmem:[%s2952_s12 + $0x30] sm:$0xe0]  ;;  %v1361_v27 = vand.u32 2147483647, %v2980_v14  ;;  %v3008_v28 = vld [vmem:[%s2952_s12 + $0x38] sm:$0xe0] }
  0x2a   : > { %v1488_v19 = vsub.f32 0.0, %v1487_v9  ;;  %v1362_v29 = vand.u32 2147483647, %v2986_v18  ;;  %v1375_v30 = vsub.f32 0.0, %v1359_v15  ;;  %v1363_v31 = vand.u32 2147483647, %v2994_v21 }
  0x2b   : > { %v1364_v33 = vand.u32 2147483647, %v3004_v26  ;;  %v1376_v34 = vsub.f32 0.0, %v1360_v22  ;;  %v1390_v35 = vmul.f32 1.442695, %v1374_v23  ;;  %v1377_v37 = vsub.f32 0.0, %v1361_v27 }
  0x2c   : > { %v1489_v32 = vmul.f32 1.442695, %v1488_v19  ;;  %v1365_v36 = vand.u32 2147483647, %v3008_v28  ;;  %v1378_v39 = vsub.f32 0.0, %v1362_v29  ;;  %v1379_v43 = vsub.f32 0.0, %v1363_v31 }
  0x2d   : > { %v1392_v40 = vmul.f32 1.442695, %v1375_v30  ;;  %v1380_v44 = vsub.f32 0.0, %v1364_v33  ;;  %v1394_v45 = vmul.f32 1.442695, %v1376_v34  ;;  %4920 = vst [vmem:[#allocation12_spill] sm:$0xff] %v3053_v4 }
  0x2e   : > { %2515 = vpow2.f32 %v1489_v32  ;;  %v1381_v46 = vsub.f32 0.0, %v1365_v36  ;;  %v1396_v47 = vmul.f32 1.442695, %v1377_v37  ;;  %v1398_v48 = vmul.f32 1.442695, %v1378_v39  ;;  %4921 = vst [vmem:[#allocation13_spill] sm:$0xff] %v3057_v5 }
  0x2f   : > { %2517 = vpow2.f32 %v1390_v35  ;;  %v1400_v51 = vmul.f32 1.442695, %v1379_v43  ;;  %v1402_v52 = vmul.f32 1.442695, %v1380_v44  ;;  %v2821_v9 = vmov 2  }
  0x30   : > { %2519 = vpow2.f32 %v1392_v40  ;;  %v1404_v53 = vmul.f32 1.442695, %v1381_v46  ;;  %v3061_v27 = vld [vmem:[%s2952_s12 + $0x40] sm:$0x1]  ;;  %v3067_v32 = vld [vmem:[%s2952_s12 + $0x48] sm:$0x1] }
  0x31   : > { %2521 = vpow2.f32 %v1394_v45  ;;  %v2386_v30 = vld [vmem:[%s2952_s12 + $0x2] ss:$8 sm:$0xf]  ;;  %v2388_v34 = vld [vmem:[%s2952_s12 + $0x3] ss:$8 sm:$0xf] }
  0x32   : > { %2523 = vpow2.f32 %v1396_v47  ;;  %v2387_v31 = vld [vmem:[%s2952_s12 + $0x2] ss:$8 sm:$0xf0]  ;;  %v2389_v37 = vld [vmem:[%s2952_s12 + $0x3] ss:$8 sm:$0xf0] }
  0x33   : > { %2525 = vpow2.f32 %v1398_v48  ;;  %v1366_v39 = vand.u32 2147483647, %v3061_v27  ;;  %v1367_v42 = vand.u32 2147483647, %v3067_v32  ;;  %v3078_v44 = vld [vmem:[%s2952_s12 + $0x58] sm:$0x1]  ;;  %v476_v45 = vor.u32 %v2389_v37, %v2388_v34 }
  0x34   : > { %2527 = vpow2.f32 %v1400_v51  ;;  %v1369_v51 = vand.u32 2147483647, %v3078_v44 }
  0x35   : > { %2529 = vpow2.f32 %v1402_v52  ;;  %v1383_v52 = vsub.f32 0.0, %v1367_v42  ;;  %v1342_v42 = vmin.f32 %v2959_v7, 0.0  ;;  %v1347_v7 = vmin.f32 %v2994_v21, 0.0 }
  0x36   : > { %2531 = vpow2.f32 %v1404_v53  ;;  %v477_v53 = vmul.f32 1.442695, %v476_v45  ;;  %v1343_v45 = vmin.f32 %v2962_v8, 0.0  ;;  %v1348_v8 = vmin.f32 %v3004_v26, 0.0 }
  0x37   : > { %v3129_v21 = vrot.slane %v3001_v25, %v3037_v58 }
  0x39   : > { %4924 = vst [vmem:[#allocation16_spill] sm:$0xff] %v3129_v21 }
  0x3b   : > { %v2516_v62 = vpop.eup %2515 }
  0x3c   : > { %v2518_v3 = vpop.eup %2517  ;;  %v1491_v15 = vadd.f32 1.0, %v2516_v62 }
  0x3d   : > { %v2520_v10 = vpop.eup %2519  ;;  %v1422_v17 = vadd.f32 1.0, %v2518_v3 }
  0x3e   : > { %v2522_v19 = vpop.eup %2521  ;;  %v1423_v23 = vadd.f32 1.0, %v2520_v10  ;;  %2533 = vlog2.f32 %v1491_v15  ;;  %v3092_v10 = vld [vmem:[%s2952_s12 + $0x70] sm:$0x1]  ;;  %v1385_v15 = vsub.f32 0.0, %v1369_v51 }
  0x3f   : > { %v2524_v22 = vpop.eup %2523  ;;  %v1424_v35 = vadd.f32 1.0, %v2522_v19  ;;  %2535 = vlog2.f32 %v1422_v17  ;;  %v1408_v17 = vmul.f32 1.442695, %v1383_v52  ;;  %v3095_v19 = vld [vmem:[%s2952_s12] ss:$8 sm:$0xf] }
  0x40   : > { %v2526_v29 = vpop.eup %2525  ;;  %2537 = vlog2.f32 %v1423_v23  ;;  %v1345_v52 = vmin.f32 %v2980_v14, 0.0 }
  0x41   : > { %v2528_v33 = vpop.eup %2527  ;;  %2539 = vlog2.f32 %v1424_v35 }
  0x42   : > { %v2530_v36 = vpop.eup %2529  ;;  %v1427_v43 = vadd.f32 1.0, %v2528_v33  ;;  %v1372_v33 = vand.u32 2147483647, %v3092_v10 }
  0x43   : > { %v2532_v40 = vpop.eup %2531  ;;  %v1428_v46 = vadd.f32 1.0, %v2530_v36  ;;  %v1412_v36 = vmul.f32 1.442695, %v1385_v15 }
  0x44   : > { %v1429_v47 = vadd.f32 1.0, %v2532_v40 }
  0x4b   : > { %v2534_v23 = vpop.eup %2533 }
  0x4c   : > { %v1493_v40 = vmul.f32 0.6931472, %v2534_v23 }
  0x96   : > { %v487_v38 = vpop.permute.xlu0 %486 }
  0x97   : > { %v489_v41 = vsub.f32 %v2944_v2, %v487_v38  ;;  %v544_v49 = vadd.f32 %v487_v38, %v2944_v2  ;;  %v1425_v38 = vadd.f32 1.0, %v2524_v22  ;;  %v3098_v22 = vld [vmem:[%s2952_s12 + $0x78] sm:$0x1] }
  0x98   : > { %v1373_v35 = vand.u32 2147483647, %v3098_v22 }
  0x99   : > { %600 = vperm.xlu0 %2505, %v489_v41   ;;  %533 = vperm.xlu1 %2504, %v489_v41   ;;  %v3074_v41 = vld [vmem:[%s2952_s12 + $0x50] sm:$0x1]  ;;  %2541 = vlog2.f32 %v1425_v38 }
  0x9a   : > { %v1224_v55 = vpop.permute.xlu0 %1223  ;;  %v1368_v48 = vand.u32 2147483647, %v3074_v41  ;;  %v1389_v51 = vsub.f32 0.0, %v1373_v35  ;;  %v3136_v35 = vrot.slane %v3001_v25, %v3042_v60 }
  0x9b   : > { %v1226_v59 = vmul.f32 %v1224_v55, %v2944_v2  ;;  %v3085_v55 = vld [vmem:[%s2952_s12 + $0x60] sm:$0x1] }
  0x9c   : > { %v1384_v62 = vsub.f32 0.0, %v1368_v48  ;;  %v1344_v48 = vmin.f32 %v2967_v11, 0.0  ;;  %v1420_v26 = vmul.f32 1.442695, %v1389_v51  ;;  %4925 = vst [vmem:[#allocation17_spill] sm:$0xff] %v3136_v35 }
  0x9d   : > { %547 = vperm.xlu1 %2504, %v544_v49   ;;  %2508 = vset.pattern.permute.xlu0 %v2818_v1 }
  0x9e   : > { %658 = vperm.xlu0 %2508, %v2944_v2   ;;  %v1410_v34 = vmul.f32 1.442695, %v1384_v62 }
  0xa1   : > { %2506 = vset.pattern.permute.xlu1 %v2817_v0 }
  0xa2   : > { %612 = vperm.xlu1 %2506, %v544_v49   ;;  %2511 = vset.pattern.permute.xlu0 %v2817_v0  ;;  %v1382_v49 = vsub.f32 0.0, %v1366_v39  ;;  %v1486_v39 = vmin.f32 %v2956_v6, 0.0 }
  0xa3   : > { %1848 = vperm.xlu0 %2511, %v3033_v57  }
  0xa4   : > { %v1406_v3 = vmul.f32 1.442695, %v1382_v49 }
  0xa6   : > { %2507 = vset.pattern.permute.xlu1 %v2821_v9 }
  0xa7   : > { %1230 = vperm.xlu1 %2507, %v1226_v59   ;;  %2514 = vset.pattern.permute.xlu0 %v2822_v16  ;;  %v3088_v59 = vld [vmem:[%s2952_s12 + $0x68] sm:$0x1] }
  0xab   : > { %2509 = vset.pattern.permute.xlu1 %v2817_v0  ;;  %v1426_v0 = vadd.f32 1.0, %v2526_v29  ;;  %v3101_v29 = vld [vmem:[%s2952_s12] ss:$8 sm:$0xf0] }
  0xac   : > { %735 = vperm.xlu1 %2509, %v2944_v2   ;;  %v469_v2 = vor.u32 %v2387_v31, %v2386_v30  ;;  %v2536_v30 = vpop.eup %2535  ;;  %v1371_v31 = vand.u32 2147483647, %v3088_v59 }
  0xad   : > { %2543 = vlog2.f32 %v1426_v0  ;;  %v2538_v37 = vpop.eup %2537  ;;  %v3113_v0 = vsub.s32 0, %v3016_v50 }
  0xae   : > { %2545 = vlog2.f32 %v1427_v43  ;;  %v1441_v49 = vmul.f32 0.6931472, %v2538_v37 }
  0xaf   : > { %2547 = vlog2.f32 %v1428_v46  ;;  %4922 = vst [vmem:[#allocation14_spill] sm:$0xff] %v3113_v0  ;;  %v1387_v46 = vsub.f32 0.0, %v1371_v31 }
  0xb0   : > { %2510 = vset.pattern.permute.xlu1 %v2818_v1  ;;  %v470_v1 = vmul.f32 1.442695, %v469_v2  ;;  %2549 = vlog2.f32 %v1429_v47  ;;  %v2540_v2 = vpop.eup %2539  ;;  %v1388_v47 = vsub.f32 0.0, %v1372_v33  ;;  %v1471_v33 = vsub.f32 %v1343_v45, %v1441_v49 }
  0xb1   : > { %1804 = vperm.xlu1 %2510, %v3033_v57   ;;  %v1443_v11 = vmul.f32 0.6931472, %v2540_v2 }
  0xb2   : > { %2551 = vpow2.f32 %v470_v1  ;;  %v1346_v1 = vmin.f32 %v2986_v18, 0.0  ;;  %v1418_v14 = vmul.f32 1.442695, %v1388_v47  ;;  %v3152_v47 = vsub.s32 6, %v3016_v50 }
  0xb3   : > { %2553 = vpow2.f32 %v1406_v3  ;;  %v1349_v3 = vmin.f32 %v3008_v28, 0.0 }
  0xb4   : > { %2555 = vpow2.f32 %v1408_v17 }
  0xb5   : > { %2512 = vset.pattern.permute.xlu1 %v2821_v9  ;;  %v1370_v9 = vand.u32 2147483647, %v3085_v55  ;;  %2557 = vpow2.f32 %v477_v53  ;;  %v1494_v53 = vsub.f32 %v1486_v39, %v1493_v40 }
  0xb6   : > { %1900 = vperm.xlu1 %2512, %v3033_v57   ;;  %2559 = vpow2.f32 %v1410_v34 }
  0xb7   : > { %v1386_v43 = vsub.f32 0.0, %v1370_v9  ;;  %2561 = vpow2.f32 %v1412_v36  ;;  %v3125_v9 = vrot.slane %v3001_v25, %v3026_v54  ;;  %v3132_v28 = vrot.slane %v1494_v53, %v3113_v0 }
  0xb8   : > { %v3140_v36 = vrot.slane %v3001_v25, %v3045_v61  ;;  %v3143_v40 = vrot.slane %v1494_v53, %v3026_v54  ;;  %v3146_v2 = vrot.slane %v1494_v53, %v3037_v58  ;;  %v3155_v49 = vrot.slane %v1494_v53, %v3042_v60 }
  0xb9   : > { %v1414_v17 = vmul.f32 1.442695, %v1386_v43  ;;  %4923 = vst [vmem:[#allocation15_spill] sm:$0xff] %v3125_v9  ;;  %v1472_v43 = vsub.f32 %v1344_v48, %v1443_v11 }
  0xba   : > { %2513 = vset.pattern.permute.xlu1 %v2822_v16  ;;  %v1439_v16 = vmul.f32 0.6931472, %v2536_v30  ;;  %v1416_v30 = vmul.f32 1.442695, %v1387_v46  ;;  %4926 = vst [vmem:[#allocation18_spill] sm:$0xff] %v3140_v36  ;;  %v3149_v46 = vsub.s32 5, %v3016_v50 }
  0xbb   : > { %1952 = vperm.xlu1 %2513, %v3033_v57   ;;  %v2542_v57 = vpop.eup %2541  ;;  %2563 = vpow2.f32 %v1414_v17 }
  0xbc   : > { %v2544_v6 = vpop.eup %2543  ;;  %v1470_v15 = vsub.f32 %v1342_v42, %v1439_v16  ;;  %v1445_v18 = vmul.f32 0.6931472, %v2542_v57  ;;  %2565 = vpow2.f32 %v1416_v30 }
  0xbd   : > { %v2546_v62 = vpop.eup %2545  ;;  %v1447_v34 = vmul.f32 0.6931472, %v2544_v6  ;;  %v3158_v6 = vsub.s32 7, %v3016_v50  ;;  %2567 = vpow2.f32 %v1418_v14  ;;  %v3174_v14 = vrot.slane %v1494_v53, %v3152_v47 }
  0xbe   : > { %v2548_v23 = vpop.eup %2547  ;;  %v1449_v37 = vmul.f32 0.6931472, %v2546_v62  ;;  %v1473_v57 = vsub.f32 %v1345_v52, %v1445_v18  ;;  %v3161_v62 = vrot.slane %v1494_v53, %v3045_v61  ;;  %v1536_v17 = vadd.f32 %v3132_v28, %v1470_v15 }
  0xbf   : > { %v2550_v31 = vpop.eup %2549  ;;  %v1451_v39 = vmul.f32 0.6931472, %v2548_v23  ;;  %v1474_v48 = vsub.f32 %v1346_v1, %v1447_v34  ;;  %v1538_v18 = vadd.f32 %v3146_v2, %v1472_v43  ;;  %2569 = vpow2.f32 %v1420_v26 }
  0xc0   : > { %v2552_v42 = vpop.eup %2551  ;;  %v1453_v16 = vmul.f32 0.6931472, %v2550_v31  ;;  %v1475_v11 = vsub.f32 %v1347_v7, %v1449_v37  ;;  %v1537_v31 = vadd.f32 %v3143_v40, %v1471_v33  ;;  %v3167_v1 = vrot.slane %v1494_v53, %v3149_v46 }
  0xc1   : > { %v2554_v45 = vpop.eup %2553  ;;  %v1476_v30 = vsub.f32 %v1348_v8, %v1451_v39  ;;  %v1539_v34 = vadd.f32 %v3155_v49, %v1473_v57  ;;  %v3171_v15 = vmul.f32 2.5, %v2991_v20  ;;  %v1540_v33 = vadd.f32 %v3161_v62, %v1474_v48  ;;  %v2385_v48 = vld [vmem:[%s2952_s12 + $0x1] ss:$8 sm:$0xf0] }
  0xc2   : > { %v2556_v51 = vpop.eup %2555  ;;  %v1477_v52 = vsub.f32 %v1349_v3, %v1453_v16  ;;  %v1430_v38 = vadd.f32 1.0, %v2554_v45  ;;  %v3177_v3 = vrot.slane %v1494_v53, %v3158_v6  ;;  %v3180_v26 = vmul.f32 0.5, %v1536_v17  ;;  %v2384_v53 = vld [vmem:[%s2952_s12 + $0x1] ss:$8 sm:$0xf]  ;;  %s3962_s12 = sand.u32 1, %s2799_s28  }
  0xc3   : > { %v2558_v23 = vpop.eup %2557  ;;  %v1431_v7 = vadd.f32 1.0, %v2556_v51  ;;  %v3182_v37 = vmul.f32 0.5, %v1537_v31  ;;  %v3186_v39 = vrot.slane %v3171_v15, %v3026_v54  ;;  %v3190_v16 = vrot.slane %v3171_v15, %v3037_v58  ;;  %s2378_s19 = sshll.u32 %s3962_s12, 6 }
  0xc4   : > { %v2560_v50 = vpop.eup %2559  ;;  %v3194_v43 = vrot.slane %v3171_v15, %v3042_v60  ;;  %v3197_v45 = vmul.f32 0.5, %v1538_v18  ;;  %v3201_v57 = vrot.slane %v3171_v15, %v3045_v61  ;;  %2571 = vlog2.f32 %v1430_v38  ;;  %s4061_s20 = scalar_lea.vmem [#allocation6], %s2378_s19  ;;  %s406_s24 = scalar_lea.vmem [#allocation4], %s2378_s19 }
  0xc5   : > { %v2562_v8 = vpop.eup %2561  ;;  %4927 = vst [vmem:[#allocation19_spill] sm:$0xff] %v3186_v39  ;;  %4928 = vst [vmem:[#allocation20_spill] sm:$0xff] %v3190_v16  ;;  %v1432_v51 = vadd.f32 1.0, %v2560_v50  ;;  %v1541_v17 = vadd.f32 %v3167_v1, %v1475_v11  ;;  %v3205_v31 = vmul.f32 0.5, %v1539_v34  ;;  %2573 = vlog2.f32 %v1431_v7  ;;  %s2150_s25 = sshll.u32 %s406_s24, 4  ;;  %s2166_s26 = sshll.u32 %s4061_s20, 4  ;;  %s4678_s25 = int_to_ptr.vmem [resolvable:$true] %s2150_s25  ;;  %s4701_s26 = int_to_ptr.vmem [resolvable:$true] %s2166_s26 }
  0xc6   : > { %4929 = vst [vmem:[#allocation21_spill] sm:$0xff] %v3194_v43  ;;  %4930 = vst [vmem:[#allocation22_spill] sm:$0xff] %v3201_v57  ;;  %v1433_v39 = vadd.f32 1.0, %v2562_v8  ;;  %v1542_v16 = vadd.f32 %v3174_v14, %v1476_v30  ;;  %v3208_v36 = vmul.f32 0.5, %v1540_v33  ;;  %v1568_v18 = vmul.f32 1.442695, %v3180_v26 }
  0xc7   : > { %v1543_v43 = vadd.f32 %v3177_v3, %v1477_v52  ;;  %v1570_v35 = vmul.f32 1.442695, %v3182_v37  ;;  %v463_v50 = vor.u32 %v2385_v48, %v2384_v53  ;;  %v1572_v38 = vmul.f32 1.442695, %v3197_v45  ;;  %s2683_s11 = scalar_lea.vmem %s4678_s25, 1024 }
  0xc8   : > { %v2564_v57 = vpop.eup %2563  ;;  %2575 = vlog2.f32 %v1432_v51  ;;  %v4931_v34 = vor.u32 %v3101_v29, %v3095_v19  ;;  %v3218_v30 = vmul.f32 0.5, %v1541_v17  ;;  %v1574_v8 = vmul.f32 1.442695, %v3205_v31  ;;  %p2684_p12 = scmp.ne.s32.totalorder %s4678_s25, %s2683_s11 }
  0xc9   : > { %v2566_v11 = vpop.eup %2565  ;;  %2577 = vlog2.f32 %v1433_v39  ;;  %v3222_v52 = vmul.f32 %v2552_v42, %v2991_v20  ;;  %v3224_v33 = vmul.f32 0.5, %v1542_v16  ;;  %v1576_v53 = vmul.f32 1.442695, %v3208_v36 }
  0xca   : > { %v458_v7 = vadd.f32 %v4931_v34, %v2972_v12  ;;  %2579 = vpow2.f32 %v1568_v18  ;;  %v3227_v51 = vmul.f32 0.5, %v1543_v43  ;;  %v1434_v48 = vadd.f32 1.0, %v2564_v57  ;;  %v2568_v21 = vpop.eup %2567  ;;  %p2685_p13 = pnand %p2684_p12, %p2915_p4 }
  0xcb   : > { %2581 = vpow2.f32 %v1570_v35  ;;  %v1435_v12 = vadd.f32 1.0, %v2566_v11  ;;  %v464_v29 = vadd.f32 %v463_v50, %v2977_v13  ;;  %v3231_v39 = vmul.f32 %v2558_v23, %v2991_v20 }
  0xcc   : > { %2583 = vpow2.f32 %v1572_v38  ;;  %v2570_v19 = vpop.eup %2569  ;;  %v1578_v42 = vmul.f32 1.442695, %v3218_v30  ;;  %v459_v16 = vmul.f32 %v458_v7, %v2991_v20  ;;  %v949_v17 = vmul.f32 0.5, %v3222_v52  ;;  %p2686_p0 = pneg %p2685_p13 }
  0xcd   : > { %2585 = vpow2.f32 %v1574_v8  ;;  %v1580_v35 = vmul.f32 1.442695, %v3224_v33  ;;  %v1582_v43 = vmul.f32 1.442695, %v3227_v51  ;;  %v3239_v13 = vmul.f32 %v464_v29, %v2991_v20 }
  0xce   : > { %2587 = vpow2.f32 %v1576_v53  ;;  %v3242_v23 = vmul.f32 0.5, %v3231_v39  ;;  %v3244_v50 = vsub.f32 %v459_v16, %v949_v17  ;;  %v1436_v38 = vadd.f32 1.0, %v2568_v21 }
  0xcf   : > { %2589 = vlog2.f32 %v1434_v48  ;;  %v1437_v11 = vadd.f32 1.0, %v2570_v19  ;;  %v1350_v34 = vmin.f32 %v3061_v27, 0.0  ;;  %v1351_v20 = vmin.f32 %v3067_v32, 0.0 }
  0xd0   : > { %2591 = vlog2.f32 %v1435_v12  ;;  %v3249_v53 = vsub.f32 %v3239_v13, %v3242_v23 }
  0xd1   : > { %v2572_v57 = vpop.eup %2571  ;;  %2593 = vpow2.f32 %v1578_v42  ;;  %v1353_v42 = vmin.f32 %v3078_v44, 0.0 }
  0xd2   : > { %v2574_v18 = vpop.eup %2573  ;;  %2595 = vpow2.f32 %v1580_v35  ;;  %v1455_v7 = vmul.f32 0.6931472, %v2572_v57  ;;  %v3274_v57 = vadd.f32 %v949_v17, %v459_v16 }
  0xd3   : > { %2597 = vpow2.f32 %v1582_v43  ;;  %v1457_v48 = vmul.f32 0.6931472, %v2574_v18  ;;  %v1352_v18 = vmin.f32 %v3074_v41, 0.0 }
  0xd4   : > { %2599 = vlog2.f32 %v1436_v38  ;;  %v1478_v19 = vsub.f32 %v1350_v34, %v1455_v7 }
  0xd5   : > { %v2576_v8 = vpop.eup %2575  ;;  %2601 = vlog2.f32 %v1437_v11  ;;  %v1479_v35 = vsub.f32 %v1351_v20, %v1457_v48 }
  0xd6   : > { %v2578_v12 = vpop.eup %2577  ;;  %v1459_v21 = vmul.f32 0.6931472, %v2576_v8 }
  0xd7   : > { %v2580_v27 = vpop.eup %2579  ;;  %v1461_v9 = vmul.f32 0.6931472, %v2578_v12  ;;  %v1545_v29 = vadd.f32 %v3143_v40, %v1479_v35 }
  0xd8   : > { %v2582_v43 = vpop.eup %2581  ;;  %v1616_v41 = vsub.f32 1.0, %v2580_v27  ;;  %v1480_v17 = vsub.f32 %v1352_v18, %v1459_v21  ;;  %v1544_v27 = vadd.f32 %v3132_v28, %v1478_v19  ;;  %v1354_v28 = vmin.f32 %v3085_v55, 0.0 }
  0xd9   : > { %v2584_v38 = vpop.eup %2583  ;;  %v1617_v20 = vsub.f32 1.0, %v2582_v43  ;;  %v1481_v7 = vsub.f32 %v1353_v42, %v1461_v9  ;;  %v1355_v19 = vmin.f32 %v3088_v59, 0.0 }
  0xda   : > { %v2586_v5 = vpop.eup %2585  ;;  %v1618_v11 = vsub.f32 1.0, %v2584_v38  ;;  %2603 = vlog2.f32 %v1616_v41  ;;  %v1546_v40 = vadd.f32 %v3146_v2, %v1480_v17  ;;  %v3297_v35 = vmul.f32 0.5, %v1544_v27 }
  0xdb   : > { %v2588_v8 = vpop.eup %2587  ;;  %v1619_v4 = vsub.f32 1.0, %v2586_v5  ;;  %2605 = vlog2.f32 %v1617_v20  ;;  %v1547_v16 = vadd.f32 %v3155_v49, %v1481_v7  ;;  %v3300_v5 = vmul.f32 0.5, %v1545_v29 }
  0xdc   : > { %v2590_v48 = vpop.eup %2589  ;;  %v1620_v18 = vsub.f32 1.0, %v2588_v8  ;;  %2607 = vlog2.f32 %v1618_v11  ;;  %v1356_v11 = vmin.f32 %v3092_v10, 0.0  ;;  %v3309_v7 = vmul.f32 0.5, %v1546_v40 }
  0xdd   : > { %v2592_v32 = vpop.eup %2591  ;;  %v1463_v9 = vmul.f32 0.6931472, %v2590_v48  ;;  %2609 = vlog2.f32 %v1619_v4  ;;  %v1584_v20 = vmul.f32 1.442695, %v3297_v35  ;;  %v1357_v48 = vmin.f32 %v3098_v22, 0.0 }
  0xde   : > { %v2594_v44 = vpop.eup %2593  ;;  %v1465_v42 = vmul.f32 0.6931472, %v2592_v32  ;;  %2611 = vlog2.f32 %v1620_v18  ;;  %4932 = vst [vmem:[#allocation23_spill] sm:$0xff] %v3309_v7  ;;  %v3313_v17 = vmul.f32 0.5, %v1547_v16  ;;  %v1586_v4 = vmul.f32 1.442695, %v3300_v5 }
  0xdf   : > { %v2596_v21 = vpop.eup %2595  ;;  %v1621_v34 = vsub.f32 1.0, %v2594_v44  ;;  %v1482_v49 = vsub.f32 %v1354_v28, %v1463_v9  ;;  %v1604_v2 = vmax.f32 %v3208_v36, -100.0 }
  0xe0   : > { %v2598_v38 = vpop.eup %2597  ;;  %v1622_v59 = vsub.f32 1.0, %v2596_v21  ;;  %v1483_v29 = vsub.f32 %v1355_v19, %v1465_v42  ;;  %4933 = vst [vmem:[#allocation24_spill] sm:$0xff] %v3313_v17  ;;  %v3322_v21 = vadd.f32 %v3242_v23, %v3239_v13  ;;  %v1588_v19 = vmul.f32 1.442695, %v3309_v7 }
  0xe1   : > { %v2600_v8 = vpop.eup %2599  ;;  %v1623_v32 = vsub.f32 1.0, %v2598_v38  ;;  %2613 = vlog2.f32 %v1621_v34  ;;  %v1548_v18 = vadd.f32 %v3161_v62, %v1482_v49  ;;  %v1590_v13 = vmul.f32 1.442695, %v3313_v17 }
  0xe2   : > { %v2602_v44 = vpop.eup %2601  ;;  %2615 = vlog2.f32 %v1622_v59  ;;  %v1467_v22 = vmul.f32 0.6931472, %v2600_v8  ;;  %v1549_v28 = vadd.f32 %v3167_v1, %v1483_v29  ;;  %v3334_v42 = vmul.f32 %v3231_v39, %v3222_v52 }
  0xe3   : > { %2617 = vlog2.f32 %v1623_v32  ;;  %v1469_v16 = vmul.f32 0.6931472, %v2602_v44  ;;  %v3346_v39 = vmul.f32 0.5, %v1548_v18  ;;  %v1601_v52 = vmax.f32 %v3182_v37, -100.0 }
  0xe4   : > { %2619 = vpow2.f32 %v1584_v20  ;;  %v1484_v38 = vsub.f32 %v1356_v11, %v1467_v22  ;;  %v3354_v49 = vmul.f32 0.5, %v1549_v28  ;;  %v3383_v28 = vrot.slane %v2998_v24, %v3149_v46 }
  0xe5   : > { %v1485_v9 = vsub.f32 %v1357_v48, %v1469_v16  ;;  %2621 = vpow2.f32 %v1586_v4  ;;  %4934 = vst [vmem:[#allocation25_spill] sm:$0xff] %v3346_v39  ;;  %v3362_v4 = vrot.slane %v2998_v24, %v3113_v0  ;;  %v1592_v18 = vmul.f32 1.442695, %v3346_v39 }
  0xe6   : > { %2623 = vpow2.f32 %v1588_v19  ;;  %v1550_v1 = vadd.f32 %v3174_v14, %v1484_v38  ;;  %4935 = vst [vmem:[#allocation26_spill] sm:$0xff] %v3354_v49  ;;  %4939 = vst [vmem:[#allocation30_spill] sm:$0xff] %v3383_v28  ;;  %v3391_v19 = vrot.slane %v2998_v24, %v3158_v6  ;;  %v3396_v48 = vrot.slane %v3001_v25, %v3113_v0 }
  0xe7   : > { %v2604_v40 = vpop.eup %2603  ;;  %v1551_v59 = vadd.f32 %v3177_v3, %v1485_v9  ;;  %2625 = vpow2.f32 %v1590_v13  ;;  %4936 = vst [vmem:[#allocation27_spill] sm:$0xff] %v3362_v4  ;;  %v1594_v13 = vmul.f32 1.442695, %v3354_v49  ;;  %v3400_v20 = vrot.slane %v3001_v25, %v3149_v46 }
  0xe8   : > { %v2606_v8 = vpop.eup %2605  ;;  %v3364_v22 = vmul.f32 0.5, %v1550_v1  ;;  %4941 = vst [vmem:[#allocation32_spill] sm:$0xff] %v3391_v19  ;;  %4942 = vst [vmem:[#allocation33_spill] sm:$0xff] %v3396_v48  ;;  %v3404_v3 = vrot.slane %v3001_v25, %v3152_v47  ;;  %v3411_v11 = vrot.slane %v3001_v25, %v3158_v6  ;;  %v1602_v23 = vmax.f32 %v3197_v45, -100.0 }
  0xe9   : > { %v2608_v29 = vpop.eup %2607  ;;  %v3372_v38 = vmul.f32 0.5, %v1551_v59  ;;  %v3387_v59 = vrot.slane %v2998_v24, %v3152_v47  ;;  %4943 = vst [vmem:[#allocation34_spill] sm:$0xff] %v3400_v20  ;;  %v1600_v24 = vmax.f32 %v3180_v26, -100.0  ;;  %v1603_v34 = vmax.f32 %v3205_v31, -100.0 }
  0xea   : > { %4937 = vst [vmem:[#allocation28_spill] sm:$0xff] %v3364_v22  ;;  %v2610_v16 = vpop.eup %2609  ;;  %4944 = vst [vmem:[#allocation35_spill] sm:$0xff] %v3404_v3  ;;  %v1596_v14 = vmul.f32 1.442695, %v3364_v22  ;;  %v1633_v10 = vmul.f32 0.6931472, %v2604_v40  ;;  %2627 = vpow2.f32 %v1592_v18  ;;  %v4976_v49 = vrot.slane %v3249_v53, %v3113_v0 }
  0xeb   : > { %4938 = vst [vmem:[#allocation29_spill] sm:$0xff] %v3372_v38  ;;  %v2612_v9 = vpop.eup %2611  ;;  %4940 = vst [vmem:[#allocation31_spill] sm:$0xff] %v3387_v59  ;;  %v1598_v32 = vmul.f32 1.442695, %v3372_v38  ;;  %v1605_v26 = vmax.f32 %v3218_v30, -100.0  ;;  %2629 = vpow2.f32 %v1594_v13  ;;  %v1606_v25 = vmax.f32 %v3224_v33, -100.0 }
  0xec   : > { %4945 = vst [vmem:[#allocation36_spill] sm:$0xff] %v3411_v11  ;;  %v1635_v55 = vmul.f32 0.6931472, %v2606_v8  ;;  %v1637_v41 = vmul.f32 0.6931472, %v2608_v29  ;;  %2631 = vpow2.f32 %v1596_v14  ;;  %v1664_v3 = vmax.f32 %v1633_v10, -100.0 }
  0xed   : > { %v1639_v11 = vmul.f32 0.6931472, %v2610_v16  ;;  %v1641_v45 = vmul.f32 0.6931472, %v2612_v9  ;;  %2633 = vpow2.f32 %v1598_v32  ;;  %v1607_v13 = vmax.f32 %v3227_v51, -100.0 }
  0xee   : > { %v2614_v1 = vpop.eup %2613  ;;  %v1665_v30 = vmax.f32 %v1635_v55, -100.0  ;;  %v1666_v29 = vmax.f32 %v1637_v41, -100.0  ;;  %v3426_v16 = vrot.slane %v3171_v15, %v3149_v46  ;;  %v3434_v51 = vrot.slane %v3171_v15, %v3158_v6 }
  0xef   : > { %v2616_v44 = vpop.eup %2615  ;;  %v1643_v18 = vmul.f32 0.6931472, %v2614_v1  ;;  %v1667_v14 = vmax.f32 %v1639_v11, -100.0  ;;  %v1668_v32 = vmax.f32 %v1641_v45, -100.0  ;;  %v3436_v55 = vrot.slane %v1664_v3, 5 }
  0xf0   : > { %v2618_v62 = vpop.eup %2617  ;;  %v1645_v36 = vmul.f32 0.6931472, %v2616_v44  ;;  %4947 = vst [vmem:[#allocation38_spill] sm:$0xff] %v3426_v16  ;;  %4949 = vst [vmem:[#allocation40_spill] sm:$0xff] %v3434_v51  ;;  %v3438_v10 = vrot.slane %v1665_v30, 5  ;;  %v3442_v44 = vrot.slane %v1666_v29, 5  ;;  %v3446_v9 = vsub.f32 %v1602_v23, %v1666_v29 }
  0xf1   : > { %v2620_v27 = vpop.eup %2619  ;;  %v1647_v33 = vmul.f32 0.6931472, %v2618_v62  ;;  %4950 = vst [vmem:[#allocation41_spill] sm:$0xff] %v3436_v55  ;;  %v3440_v62 = vsub.f32 %v1600_v24, %v1664_v3  ;;  %v3448_v1 = vrot.slane %v1667_v14, 5  ;;  %v3454_v45 = vsub.f32 %v1604_v2, %v1668_v32 }
  0xf2   : > { %v2622_v37 = vpop.eup %2621  ;;  %v1624_v12 = vsub.f32 1.0, %v2620_v27  ;;  %v3422_v27 = vrot.slane %v3171_v15, %v3113_v0  ;;  %v1670_v41 = vmax.f32 %v1645_v36, -100.0  ;;  %4951 = vst [vmem:[#allocation42_spill] sm:$0xff] %v3438_v10  ;;  %4952 = vst [vmem:[#allocation43_spill] sm:$0xff] %v3442_v44  ;;  %v4977_v39 = vrot.slane %v3249_v53, %v3026_v54 }
  0xf3   : > { %v2624_v43 = vpop.eup %2623  ;;  %v1625_v31 = vsub.f32 1.0, %v2622_v37  ;;  %v1671_v11 = vmax.f32 %v1647_v33, -100.0  ;;  %4954 = vst [vmem:[#allocation45_spill] sm:$0xff] %v3446_v9  ;;  %4955 = vst [vmem:[#allocation46_spill] sm:$0xff] %v3448_v1  ;;  %v3450_v37 = vrot.slane %v1668_v32, 5  ;;  %v4979_v17 = vrot.slane %v3249_v53, %v3042_v60 }
  0xf4   : > { %v2626_v40 = vpop.eup %2625  ;;  %v1626_v20 = vsub.f32 1.0, %v2624_v43  ;;  %2635 = vlog2.f32 %v1624_v12  ;;  %4946 = vst [vmem:[#allocation37_spill] sm:$0xff] %v3422_v27  ;;  %v1669_v12 = vmax.f32 %v1643_v18, -100.0  ;;  %v3430_v43 = vrot.slane %v3171_v15, %v3152_v47  ;;  %4958 = vst [vmem:[#allocation49_spill] sm:$0xff] %v3454_v45 }
  0xf5   : > { %v1627_v8 = vsub.f32 1.0, %v2626_v40  ;;  %2637 = vlog2.f32 %v1625_v31  ;;  %4956 = vst [vmem:[#allocation47_spill] sm:$0xff] %v3450_v37  ;;  %v3452_v15 = vsub.f32 %v1603_v34, %v1667_v14  ;;  %v3464_v24 = vrot.slane %v1670_v41, 5 }
  0xf6   : > { %2639 = vlog2.f32 %v1626_v20  ;;  %4948 = vst [vmem:[#allocation39_spill] sm:$0xff] %v3430_v43  ;;  %v3444_v20 = vsub.f32 %v1601_v52, %v1665_v30  ;;  %v3456_v31 = vrot.slane %v1669_v12, 5  ;;  %v3458_v40 = vsub.f32 %v1605_v26, %v1669_v12 }
  0xf7   : > { %2641 = vlog2.f32 %v1627_v8  ;;  %4957 = vst [vmem:[#allocation48_spill] sm:$0xff] %v3452_v15  ;;  %v2628_v23 = vpop.eup %2627  ;;  %4961 = vst [vmem:[#allocation52_spill] sm:$0xff] %v3464_v24  ;;  %v3466_v18 = vsub.f32 %v1606_v25, %v1670_v41  ;;  %v3468_v36 = vsub.f32 %v1607_v13, %v1671_v11  ;;  %v3472_v30 = vrot.slane %v1671_v11, 5 }
  0xf8   : > { %4953 = vst [vmem:[#allocation44_spill] sm:$0xff] %v3444_v20  ;;  %4959 = vst [vmem:[#allocation50_spill] sm:$0xff] %v3456_v31  ;;  %v2630_v34 = vpop.eup %2629  ;;  %v1628_v25 = vsub.f32 1.0, %v2628_v23  ;;  %v4968_v26 = vrot.slane %v3244_v50, %v3026_v54  ;;  %v4995_v59 = vrot.slane %v3322_v21, %v3037_v58  ;;  %v4996_v63 = vrot.slane %v3322_v21, %v3042_v60 }
  0xf9   : > { %4960 = vst [vmem:[#allocation51_spill] sm:$0xff] %v3458_v40  ;;  %4962 = vst [vmem:[#allocation53_spill] sm:$0xff] %v3466_v18  ;;  %v2632_v29 = vpop.eup %2631  ;;  %v1629_v32 = vsub.f32 1.0, %v2630_v34  ;;  %v5000_v18 = vrot.slane %v3322_v21, %v3158_v6 }
  0xfa   : > { %4963 = vst [vmem:[#allocation54_spill] sm:$0xff] %v3468_v36  ;;  %4964 = vst [vmem:[#allocation55_spill] sm:$0xff] %v3472_v30  ;;  %v2634_v12 = vpop.eup %2633  ;;  %v1630_v33 = vsub.f32 1.0, %v2632_v29  ;;  %2643 = vlog2.f32 %v1628_v25  ;;  %v4970_v25 = vrot.slane %v3244_v50, %v3042_v60  ;;  %v4999_v36 = vrot.slane %v3322_v21, %v3152_v47 }
  0xfb   : > { %v1631_v52 = vsub.f32 1.0, %v2634_v12  ;;  %2645 = vlog2.f32 %v1629_v32 }
  0xfc   : > { %2647 = vlog2.f32 %v1630_v33  ;;  %v4967_v33 = vrot.slane %v3244_v50, %v3113_v0 }
  0xfd   : > { %2649 = vlog2.f32 %v1631_v52 }
 0x101   : > { %v2636_v8 = vpop.eup %2635 }
 0x102   : > { %v2638_v3 = vpop.eup %2637  ;;  %v3514_v13 = vmul.f32 0.6931472, %v2636_v8 }
 0x103   : > { %v2640_v14 = vpop.eup %2639  ;;  %v3516_v11 = vmul.f32 0.6931472, %v2638_v3 }
 0x104   : > { %v2642_v29 = vpop.eup %2641  ;;  %v3532_v2 = vmul.f32 0.6931472, %v2640_v14  ;;  %v4969_v14 = vrot.slane %v3244_v50, %v3037_v58 }
 0x105   : > { %v3534_v32 = vmul.f32 0.6931472, %v2642_v29 }
 0x114   : > { %v3525_v8 = vpop.permute.xlu1 %533  ;;  %v3530_v23 = vpop.permute.xlu0 %600 }
 0x115   : > { %4965 = vst [vmem:[#allocation56_spill] sm:$0xff] %v3525_v8  ;;  %4966 = vst [vmem:[#allocation57_spill] sm:$0xff] %v3530_v23  ;;  %v3542_v3 = vmax.f32 %v3525_v8, %v4967_v33  ;;  %v3548_v52 = vmax.f32 %v3525_v8, %v4968_v26  ;;  %v3554_v29 = vmax.f32 %v3525_v8, %v4969_v14 }
 0x116   : > { %v3560_v12 = vmax.f32 %v3525_v8, %v4970_v25  ;;  %v4971_v33 = vrot.slane %v3244_v50, %v3045_v61  ;;  %v4972_v26 = vrot.slane %v3244_v50, %v3149_v46  ;;  %v4973_v14 = vrot.slane %v3244_v50, %v3152_v47 }
 0x117   : > { %v4974_v25 = vrot.slane %v3244_v50, %v3158_v6  ;;  %v4978_v50 = vrot.slane %v3249_v53, %v3037_v58  ;;  %v3610_v7 = vmax.f32 %v3530_v23, %v4979_v17  ;;  %v4983_v17 = vrot.slane %v3274_v57, %v3042_v60 }
 0x118   : > { %v3566_v41 = vmax.f32 %v3525_v8, %v4971_v33  ;;  %v3572_v34 = vmax.f32 %v3525_v8, %v4972_v26  ;;  %v3578_v38 = vmax.f32 %v3525_v8, %v4973_v14  ;;  %v3586_v33 = vpop.permute.xlu1 %547  ;;  %v3592_v26 = vmax.f32 %v3530_v23, %v4976_v49 }
 0x119   : > { %v3584_v22 = vmax.f32 %v3525_v8, %v4974_v25  ;;  %4975 = vst [vmem:[#allocation58_spill] sm:$0xff] %v3586_v33  ;;  %v3598_v14 = vmax.f32 %v3530_v23, %v4977_v39  ;;  %v3604_v25 = vmax.f32 %v3530_v23, %v4978_v50  ;;  %v4980_v49 = vrot.slane %v3274_v57, %v3113_v0 }
 0x11a   : > { %v4981_v39 = vrot.slane %v3274_v57, %v3026_v54  ;;  %v4982_v50 = vrot.slane %v3274_v57, %v3037_v58  ;;  %v3634_v37 = vmin.f32 %v3586_v33, %v4983_v17  ;;  %v4987_v17 = vrot.slane %v3249_v53, %v3149_v46 }
 0x11b   : > { %v3616_v30 = vmin.f32 %v3586_v33, %v4980_v49  ;;  %v4984_v49 = vrot.slane %v3274_v57, %v3045_v61  ;;  %v4998_v8 = vrot.slane %v3322_v21, %v3149_v46 }
 0x11c   : > { %v3622_v24 = vmin.f32 %v3586_v33, %v4981_v39  ;;  %v3628_v31 = vmin.f32 %v3586_v33, %v4982_v50  ;;  %v4985_v39 = vrot.slane %v3274_v57, %v3149_v46  ;;  %v4986_v50 = vrot.slane %v3249_v53, %v3045_v61 }
 0x11d   : > { %v3640_v1 = vmin.f32 %v3586_v33, %v4984_v49  ;;  %v3658_v55 = vmax.f32 %v3530_v23, %v4987_v17  ;;  %v4988_v49 = vrot.slane %v3274_v57, %v3152_v47  ;;  %v4991_v17 = vrot.slane %v3249_v53, %v3158_v6 }
 0x11e   : > { %v3646_v44 = vmin.f32 %v3586_v33, %v4985_v39  ;;  %v3652_v10 = vmax.f32 %v3530_v23, %v4986_v50  ;;  %v4989_v39 = vrot.slane %v3274_v57, %v3158_v6  ;;  %v4990_v50 = vrot.slane %v3249_v53, %v3152_v47  ;;  %v3692_v57 = vpop.permute.xlu1 %612 }
 0x11f   : > { %v3664_v51 = vmin.f32 %v3586_v33, %v4988_v49  ;;  %v3682_v27 = vmax.f32 %v3530_v23, %v4991_v17  ;;  %vm1151_vm0 = vcmp.lt.f32.partialorder %v3542_v3, %v3616_v30  ;;  %vm1152_vm1 = vcmp.lt.f32.partialorder %v3548_v52, %v3622_v24  ;;  %4992 = vst [vmem:[#allocation59_spill] sm:$0xff] %v3692_v57  ;;  %v3704_v17 = vpop.eup %2643 }
 0x120   : > { %v3670_v43 = vmin.f32 %v3586_v33, %v4989_v39  ;;  %v3676_v16 = vmax.f32 %v3530_v23, %v4990_v50  ;;  %vm1153_vm2 = vcmp.lt.f32.partialorder %v3554_v29, %v3628_v31  ;;  %vm1154_vm3 = vcmp.lt.f32.partialorder %v3560_v12, %v3634_v37  ;;  %v3724_v4 = vpop.eup %2645 }
 0x121   : > { %vm1155_vm4 = vcmp.lt.f32.partialorder %v3566_v41, %v3640_v1  ;;  %v1191_v53 = vsub.f32 %v3616_v30, %v3542_v3  ;;  %v1192_v49 = vsub.f32 %v3622_v24, %v3548_v52  ;;  %v1193_v39 = vsub.f32 %v3628_v31, %v3554_v29  ;;  %v3744_v45 = vpop.eup %2647 }
 0x122   : > { %v1194_v50 = vsub.f32 %v3634_v37, %v3560_v12  ;;  %v4993_v23 = vrot.slane %v3322_v21, %v3113_v0  ;;  %v4994_v33 = vrot.slane %v3322_v21, %v3026_v54  ;;  %v1145_v28 = vmin.f32 %v3692_v57, %v4995_v59  ;;  %5001 = vst [vmem:[#allocation60_spill] sm:$0xff] %v3744_v45 }
 0x123   : > { %v1146_v56 = vmin.f32 %v3692_v57, %v4996_v63  ;;  %vm1156_vm5 = vcmp.lt.f32.partialorder %v3572_v34, %v3646_v44  ;;  %v1148_v59 = vmin.f32 %v3692_v57, %v4998_v8  ;;  %v1149_v63 = vmin.f32 %v3692_v57, %v4999_v36 }
 0x124   : > { %v1143_v48 = vmin.f32 %v3692_v57, %v4993_v23  ;;  %v1144_v19 = vmin.f32 %v3692_v57, %v4994_v33  ;;  %v4997_v23 = vrot.slane %v3322_v21, %v3045_v61  ;;  %v1150_v40 = vmin.f32 %v3692_v57, %v5000_v18  ;;  %v3756_v18 = vpop.eup %2649 }
 0x125   : > { %v1195_v8 = vsub.f32 %v3640_v1, %v3566_v41  ;;  %v1197_v36 = vsub.f32 %v3664_v51, %v3578_v38  ;;  %v1198_v21 = vsub.f32 %v3670_v43, %v3584_v22  ;;  %5002 = vst [vmem:[#allocation61_spill] sm:$0xff] %v3756_v18  ;;  %vm1161_vm10 = vcmp.lt.f32.partialorder %v3604_v25, %v1145_v28  ;;  %v1231_v18 = vpop.permute.xlu1 %1230 }
 0x126   : > { %v1147_v33 = vmin.f32 %v3692_v57, %v4997_v23  ;;  %v1196_v23 = vsub.f32 %v3646_v44, %v3572_v34  ;;  %vm1159_vm8 = vcmp.lt.f32.partialorder %v3592_v26, %v1143_v48  ;;  %vm1160_vm9 = vcmp.lt.f32.partialorder %v3598_v14, %v1144_v19  ;;  %vm1169_vm15 = vmand %vm1153_vm2, %vm1161_vm10 }
 0x127   : > { %vm1162_vm11 = vcmp.lt.f32.partialorder %v3610_v7, %v1146_v56  ;;  %vm1164_vm13 = vcmp.lt.f32.partialorder %v3658_v55, %v1148_v59  ;;  %vm1165_vm14 = vcmp.lt.f32.partialorder %v3676_v16, %v1149_v63  ;;  %vm1167_vm7 = vmand %vm1151_vm0, %vm1159_vm8  ;;  %v4878_v45 = vmov 0.0  }
 0x128   : > { %vm1163_vm12 = vcmp.lt.f32.partialorder %v3652_v10, %v1147_v33  ;;  %vm1168_vm6 = vmand %vm1152_vm1, %vm1160_vm9  ;;  %v2406_v57 = vsel %vm1167_vm7, 1.0, %v4878_v45  ;;  %v1199_v15 = vsub.f32 %v1143_v48, %v3592_v26  ;;  %v1200_v9 = vsub.f32 %v1144_v19, %v3598_v14 }
 0x129   : > { %v1201_v20 = vsub.f32 %v1145_v28, %v3604_v25  ;;  %v2407_v30 = vsel %vm1168_vm6, 1.0, %v4878_v45  ;;  %v1202_v3 = vsub.f32 %v1146_v56, %v3610_v7  ;;  %v1203_v24 = vsub.f32 %v1147_v33, %v3652_v10  ;;  %vm1170_vm0 = vmand %vm1154_vm3, %vm1162_vm11 }
 0x12a   : > { %v1204_v52 = vsub.f32 %v1148_v59, %v3658_v55  ;;  %v2408_v48 = vsel %vm1169_vm15, 1.0, %v4878_v45  ;;  %v1205_v28 = vsub.f32 %v1149_v63, %v3676_v16  ;;  %v1206_v19 = vsub.f32 %v1150_v40, %v3682_v27  ;;  %vm1171_vm1 = vmand %vm1155_vm4, %vm1163_vm12 }
 0x12b   : > { %v1207_v31 = vmul.f32 %v1199_v15, %v1191_v53  ;;  %v2409_v29 = vsel %vm1170_vm0, 1.0, %v4878_v45  ;;  %v1208_v56 = vmul.f32 %v1200_v9, %v1192_v49  ;;  %v1209_v7 = vmul.f32 %v1201_v20, %v1193_v39  ;;  %vm1172_vm2 = vmand %vm1156_vm5, %vm1164_vm13 }
 0x12c   : > { %v1210_v26 = vmul.f32 %v1202_v3, %v1194_v50  ;;  %v2410_v37 = vsel %vm1171_vm1, 1.0, %v4878_v45  ;;  %v1211_v15 = vmul.f32 %v1203_v24, %v1195_v8  ;;  %v1212_v12 = vmul.f32 %v1204_v52, %v1196_v23 }
 0x12d   : > { %v1213_v10 = vmul.f32 %v1205_v28, %v1197_v36  ;;  %vm5003_vm3 = vcmp.lt.f32.partialorder %v3578_v38, %v3664_v51  ;;  %v2411_v20 = vsel %vm1172_vm2, 1.0, %v4878_v45  ;;  %v1214_v9 = vmul.f32 %v1206_v19, %v1198_v21  ;;  %v3825_v51 = vpop.permute.xlu1 %735 }
 0x12e   : > { %vm1173_vm4 = vmand %vm5003_vm3, %vm1165_vm14  ;;  %v3809_v1 = vmul.f32 %v2406_v57, %v1207_v31  ;;  %v3811_v55 = vmul.f32 %v2407_v30, %v1208_v56  ;;  %vm5004_vm5 = vcmp.lt.f32.partialorder %v3682_v27, %v1150_v40  ;;  %vm5005_vm6 = vcmp.lt.f32.partialorder %v3584_v22, %v3670_v43 }
 0x12f   : > { %vm1174_vm7 = vmand %vm5005_vm6, %vm5004_vm5  ;;  %v2412_v44 = vsel %vm1173_vm4, 1.0, %v4878_v45  ;;  %v3819_v16 = vmul.f32 %v2408_v48, %v1209_v7  ;;  %v3821_v41 = vmul.f32 %v2409_v29, %v1210_v26  ;;  %v3823_v38 = vmul.f32 %v2410_v37, %v1211_v15 }
 0x130   : > { %v2413_v34 = vsel %vm1174_vm7, 1.0, %v4878_v45  ;;  %v3828_v14 = vmul.f32 %v2411_v20, %v1212_v12  ;;  %v3830_v25 = vmul.f32 %v2412_v44, %v1213_v10  ;;  %v5006_v22 = vrot.slane %v3334_v42, %v3113_v0  ;;  %v3884_v44 = vpop.permute.xlu0 %658 }
 0x131   : > { %v3835_v43 = vmul.f32 %v2413_v34, %v1214_v9  ;;  %v5007_v40 = vrot.slane %v3334_v42, %v3026_v54  ;;  %v5008_v53 = vrot.slane %v3334_v42, %v3037_v58  ;;  %v5009_v39 = vrot.slane %v3334_v42, %v3042_v60  ;;  %v1805_v3 = vpop.permute.xlu1 %1804  ;;  %5018 = vst [vmem:[#allocation63_spill] sm:$0xff] %v3884_v44 }
 0x132   : > { %v1274_v27 = vadd.f32 %v5006_v22, %v1231_v18  ;;  %v5010_v33 = vrot.slane %v3334_v42, %v3045_v61  ;;  %v5011_v63 = vrot.slane %v3334_v42, %v3149_v46  ;;  %v5012_v54 = vrot.slane %v3334_v42, %v3152_v47 }
 0x133   : > { %v1275_v57 = vadd.f32 %v5007_v40, %v1231_v18  ;;  %v1276_v49 = vadd.f32 %v5008_v53, %v1231_v18  ;;  %v1277_v50 = vadd.f32 %v5009_v39, %v1231_v18  ;;  %v5013_v58 = vrot.slane %v3334_v42, %v3158_v6 }
 0x134   : > { %v1278_v59 = vadd.f32 %v5010_v33, %v1231_v18  ;;  %v1279_v8 = vadd.f32 %v5011_v63, %v1231_v18  ;;  %v1280_v23 = vadd.f32 %v5012_v54, %v1231_v18  ;;  %v1282_v21 = vsub.f32 %v1274_v27, %v3809_v1 }
 0x135   : > { %v1281_v36 = vadd.f32 %v5013_v58, %v1231_v18  ;;  %v1283_v60 = vsub.f32 %v1275_v57, %v3811_v55  ;;  %v1284_v30 = vsub.f32 %v1276_v49, %v3819_v16  ;;  %v1285_v61 = vsub.f32 %v1277_v50, %v3821_v41  ;;  %v5024_v49 = vld [vmem:[#allocation44_spill] sm:$0xff] }
 0x136   : > { %v1286_v24 = vsub.f32 %v1278_v59, %v3823_v38  ;;  %v1287_v52 = vsub.f32 %v1279_v8, %v3828_v14  ;;  %v3865_v48 = vmul.f32 0.6931472, %v3704_v17  ;;  %v1288_v42 = vsub.f32 %v1280_v23, %v3830_v25  ;;  %v5028_v59 = vld [vmem:[#allocation45_spill] sm:$0xff] }
 0x137   : > { %v1290_v18 = vmax.f32 %v1282_v21, 1e-12  ;;  %v1291_v19 = vmax.f32 %v1283_v60, 1e-12  ;;  %v1292_v31 = vmax.f32 %v1284_v30, 1e-12  ;;  %v1289_v29 = vsub.f32 %v1281_v36, %v3835_v43 }
 0x138   : > { %v1293_v56 = vmax.f32 %v1285_v61, 1e-12  ;;  %v5014_v7 = vmax.f32 %v3514_v13, -100.0  ;;  %v5016_v15 = vmax.f32 %v3297_v35, -100.0  ;;  %v1294_v12 = vmax.f32 %v1286_v24, 1e-12 }
 0x139   : > { %2651 = vrcp.f32 %v1290_v18  ;;  %v3881_v10 = vmul.f32 0.6931472, %v3724_v4  ;;  %v1295_v9 = vmax.f32 %v1287_v52, 1e-12  ;;  %v5019_v34 = vmax.f32 %v3516_v11, -100.0  ;;  %v1901_v4 = vpop.permute.xlu1 %1900  ;;  %v5034_v21 = vld [vmem:[#allocation48_spill] sm:$0xff] }
 0x13a   : > { %v3872_v26 = vrot.slane %v5014_v7, 5  ;;  %v5015_v37 = vmov %v5014_v7  ;;  %2653 = vrcp.f32 %v1291_v19  ;;  %v5021_v35 = vmax.f32 %v3300_v5, -100.0  ;;  %v5037_v61 = vld [vmem:[#allocation49_spill] sm:$0xff]  ;;  %v1849_v7 = vpop.permute.xlu0 %1848 }
 0x13b   : > { %v3878_v17 = vsub.f32 %v5016_v15, %v5015_v37  ;;  %v3888_v22 = vrot.slane %v5019_v34, 5  ;;  %v5020_v13 = vmov %v5019_v34  ;;  %v1296_v40 = vmax.f32 %v1288_v42, 1e-12  ;;  %v5040_v42 = vld [vmem:[#allocation51_spill] sm:$0xff]  ;;  %v5046_v37 = vld [vmem:[#allocation54_spill] sm:$0xff] }
 0x13c   : > { %v3894_v27 = vsub.f32 %v5021_v35, %v5020_v13  ;;  %2655 = vrcp.f32 %v1292_v31  ;;  %v5023_v57 = vrot.slane %v3440_v62, %v3149_v46  ;;  %v5025_v39 = vrot.slane %v5024_v49, %v3149_v46  ;;  %v5043_v31 = vld [vmem:[#allocation53_spill] sm:$0xff] }
 0x13d   : > { %5017 = vst [vmem:[#allocation62_spill] sm:$0xff] %v3878_v17  ;;  %v1297_v33 = vmax.f32 %v1289_v29, 1e-12  ;;  %2657 = vrcp.f32 %v1293_v56  ;;  %v5026_v5 = vrot.slane %v3440_v62, %v3158_v6  ;;  %v5029_v63 = vrot.slane %v5028_v59, %v3149_v46 }
 0x13e   : > { %5022 = vst [vmem:[#allocation64_spill] sm:$0xff] %v3894_v27  ;;  %v3899_v53 = vmul.f32 %v5023_v57, %v1805_v3  ;;  %v3904_v50 = vmul.f32 %v5025_v39, %v1805_v3  ;;  %2659 = vrcp.f32 %v1294_v12  ;;  %v5030_v54 = vrot.slane %v5024_v49, %v3158_v6 }
 0x13f   : > { %v3909_v11 = vmul.f32 %v5026_v5, %v1901_v4  ;;  %v3914_v8 = vmul.f32 %v5029_v63, %v1805_v3  ;;  %v5032_v58 = vrot.slane %v5028_v59, %v3158_v6  ;;  %v5035_v60 = vrot.slane %v5034_v21, %v3158_v6 }
 0x140   : > { %v3919_v23 = vmul.f32 %v5030_v54, %v1901_v4  ;;  %2661 = vrcp.f32 %v1295_v9  ;;  %v5038_v24 = vrot.slane %v5037_v61, %v3158_v6  ;;  %v5041_v18 = vrot.slane %v5040_v42, %v3158_v6 }
 0x141   : > { %5027 = vst [vmem:[#allocation44_spill] sm:$0xff] %v3909_v11  ;;  %v3924_v36 = vmul.f32 %v5032_v58, %v1901_v4  ;;  %v3929_v30 = vmul.f32 %v5035_v60, %v1901_v4  ;;  %v5044_v29 = vrot.slane %v5043_v31, %v3158_v6  ;;  %2663 = vrcp.f32 %v1296_v40 }
 0x142   : > { %5031 = vst [vmem:[#allocation45_spill] sm:$0xff] %v3919_v23  ;;  %v3934_v52 = vmul.f32 %v5038_v24, %v1901_v4  ;;  %v3939_v19 = vmul.f32 %v5041_v18, %v1901_v4  ;;  %v5047_v15 = vrot.slane %v5046_v37, %v3158_v6  ;;  %v5049_v9 = vrot.slane %v5034_v21, %v3149_v46 }
 0x143   : > { %5033 = vst [vmem:[#allocation65_spill] sm:$0xff] %v3924_v36  ;;  %5036 = vst [vmem:[#allocation48_spill] sm:$0xff] %v3929_v30  ;;  %v3944_v56 = vmul.f32 %v5044_v29, %v1901_v4  ;;  %v5050_v13 = vrot.slane %v5037_v61, %v3149_v46  ;;  %2665 = vrcp.f32 %v1297_v33  ;;  %v5051_v40 = vrot.slane %v5040_v42, %v3149_v46  ;;  %v5076_v36 = vld [vmem:[#allocation16_spill] sm:$0xff] }
 0x144   : > { %5039 = vst [vmem:[#allocation49_spill] sm:$0xff] %v3934_v52  ;;  %5042 = vst [vmem:[#allocation51_spill] sm:$0xff] %v3939_v19  ;;  %v3949_v12 = vmul.f32 %v5047_v15, %v1901_v4  ;;  %v3954_v34 = vmul.f32 %v5049_v9, %v1805_v3  ;;  %v5052_v4 = vrot.slane %v5043_v31, %v3149_v46  ;;  %v5075_v52 = vld [vmem:[#allocation15_spill] sm:$0xff]  ;;  %vm1696_vm8 = vcmask 1042432  }
 0x145   : > { %5045 = vst [vmem:[#allocation53_spill] sm:$0xff] %v3944_v56  ;;  %v3959_v35 = vmul.f32 %v5050_v13, %v1805_v3  ;;  %v3967_v6 = vmul.f32 %v5051_v40, %v1805_v3  ;;  %v5053_v39 = vrot.slane %v5046_v37, %v3149_v46  ;;  %v5054_v63 = vrot.slane %v3440_v62, %v3152_v47  ;;  %v5074_v56 = vld [vmem:[#allocation59_spill] sm:$0xff] }
 0x146   : > { %5048 = vst [vmem:[#allocation54_spill] sm:$0xff] %v3949_v12  ;;  %v3972_v57 = vmul.f32 %v5052_v4, %v1805_v3  ;;  %v5055_v33 = vrot.slane %v5024_v49, %v3152_v47  ;;  %v5056_v60 = vrot.slane %v5028_v59, %v3152_v47  ;;  %v5057_v18 = vrot.slane %v5034_v21, %v3152_v47  ;;  %v5065_v4 = vld [vmem:[#allocation10_spill] sm:$0xff]  ;;  %v5073_v12 = vld [vmem:[#allocation33_spill] sm:$0xff] }
 0x147   : > { %v3977_v5 = vmul.f32 %v5053_v39, %v1805_v3  ;;  %v1883_v54 = vmul.f32 %v5054_v63, %v1849_v7  ;;  %v5058_v46 = vrot.slane %v5037_v61, %v3152_v47  ;;  %v5059_v62 = vrot.slane %v5040_v42, %v3152_v47  ;;  %v5064_v61 = vld [vmem:[#allocation27_spill] sm:$0xff]  ;;  %v2652_v39 = vpop.eup %2651 }
 0x148   : > { %v1884_v58 = vmul.f32 %v5055_v33, %v1849_v7  ;;  %v1885_v24 = vmul.f32 %v5056_v60, %v1849_v7  ;;  %v1886_v29 = vmul.f32 %v5057_v18, %v1849_v7  ;;  %v5060_v49 = vrot.slane %v5043_v31, %v3152_v47  ;;  %v5066_v42 = vld [vmem:[#allocation11_spill] sm:$0xff]  ;;  %v5067_v33 = vld [vmem:[#allocation12_spill] sm:$0xff]  ;;  %v5068_v60 = vld [vmem:[#allocation13_spill] sm:$0xff]  ;;  %v2654_v20 = vpop.eup %2653 }
 0x149   : > { %v3994_v3 = vmul.f32 %v5058_v46, %v1849_v7  ;;  %v3999_v15 = vmul.f32 %v5059_v62, %v1849_v7  ;;  %v5061_v59 = vrot.slane %v5046_v37, %v3152_v47  ;;  %v5069_v47 = vld [vmem:[#allocation30_spill] sm:$0xff]  ;;  %v5070_v37 = vld [vmem:[#allocation31_spill] sm:$0xff]  ;;  %v5071_v62 = vld [vmem:[#allocation32_spill] sm:$0xff]  ;;  %v1299_v28 = vmul.f32 %v2652_v39, %v3809_v1  ;;  %v2656_v11 = vpop.eup %2655 }
 0x14a   : > { %v4004_v9 = vmul.f32 %v5060_v49, %v1849_v7  ;;  %v615_v19 = vsub.f32 %v5074_v56, %v5073_v12  ;;  %v616_v30 = vsub.f32 %v5074_v56, %v5075_v52  ;;  %v617_v23 = vsub.f32 %v5074_v56, %v5076_v36  ;;  %v2658_v39 = vpop.eup %2657 }
 0x14b   : > { %v4009_v21 = vmul.f32 %v5061_v59, %v1849_v7  ;;  %v5072_v59 = vld [vmem:[#allocation58_spill] sm:$0xff]  ;;  %v1301_v44 = vmul.f32 %v2654_v20, %v3811_v55  ;;  %1314 = vst [vmem:[%s4061_s20] sm:$0xff] %v1299_v28  ;;  %v4065_v55 = vadd.f32 %v1883_v54, %v3899_v53  ;;  %v5081_v20 = vld [vmem:[#allocation35_spill] sm:$0xff]  ;;  %vm1729_vm9 = vcmask 1043456  }
 0x14c   : > { %v550_v45 = vsub.f32 %v5072_v59, %v5064_v61  ;;  %v551_v63 = vsub.f32 %v5072_v59, %v5065_v4  ;;  %v552_v31 = vsub.f32 %v5072_v59, %v5066_v42  ;;  %v553_v18 = vsub.f32 %v5072_v59, %v5067_v33  ;;  %v5082_v4 = vld [vmem:[#allocation36_spill] sm:$0xff]  ;;  %v2660_v61 = vpop.eup %2659 }
 0x14d   : > { %5062 = vst [vmem:[#allocation66_spill] sm:$0xff] %v4009_v21  ;;  %v554_v7 = vsub.f32 %v5072_v59, %v5068_v60  ;;  %v555_v49 = vsub.f32 %v5072_v59, %v5069_v47  ;;  %v556_v46 = vsub.f32 %v5072_v59, %v5070_v37  ;;  %v557_v40 = vsub.f32 %v5072_v59, %v5071_v62  ;;  %v5077_v47 = vld [vmem:[#allocation17_spill] sm:$0xff]  ;;  %v5078_v60 = vld [vmem:[#allocation18_spill] sm:$0xff]  ;;  %v2662_v0 = vpop.eup %2661 }
 0x14e   : > { %v618_v37 = vsub.f32 %v5074_v56, %v5077_v47  ;;  %v619_v59 = vsub.f32 %v5074_v56, %v5078_v60  ;;  %v5079_v62 = vld [vmem:[#allocation34_spill] sm:$0xff]  ;;  %v1303_v33 = vmul.f32 %v2656_v11, %v3819_v16  ;;  %5080 = vst [vmem:[#allocation58_spill] sm:$0xff] %v4065_v55  ;;  %v621_v42 = vsub.f32 %v5074_v56, %v5081_v20  ;;  %v2664_v21 = vpop.eup %2663 }
 0x14f   : > { %v620_v1 = vsub.f32 %v5074_v56, %v5079_v62  ;;  %v622_v13 = vsub.f32 %v5074_v56, %v5082_v4  ;;  %v1305_v16 = vmul.f32 %v2658_v39, %v3821_v41  ;;  %1315 = vst [vmem:[%s4061_s20 + $0x8] sm:$0xff] %v1301_v44  ;;  %v2027_v11 = vadd.f32 1e-08, %v1299_v28 }
 0x150   : > { %v4073_v27 = vmin.f32 %v550_v45, %v615_v19  ;;  %v4075_v17 = vmin.f32 %v551_v63, %v616_v30  ;;  %v1307_v53 = vmul.f32 %v2660_v61, %v3823_v38  ;;  %1316 = vst [vmem:[%s4061_s20 + $0x10] sm:$0xff] %v1303_v33  ;;  %v2028_v54 = vadd.f32 1e-08, %v1301_v44  ;;  %v2666_v38 = vpop.eup %2665 }
 0x151   : > { %v4080_v55 = vadd.f32 %v1884_v58, %v3904_v50  ;;  %v4082_v56 = vmin.f32 %v552_v31, %v617_v23  ;;  %v1309_v41 = vmul.f32 %v2662_v0, %v3828_v14  ;;  %1317 = vst [vmem:[%s4061_s20 + $0x18] sm:$0xff] %v1305_v16  ;;  %v2029_v45 = vadd.f32 1e-08, %v1303_v33  ;;  %v5092_v31 = vld [vmem:[#allocation38_spill] sm:$0xff] }
 0x152   : > { %v4087_v28 = vadd.f32 %v1885_v24, %v3914_v8  ;;  %v4089_v30 = vmin.f32 %v553_v18, %v618_v37  ;;  %v1311_v44 = vmul.f32 %v2664_v21, %v3830_v25  ;;  %1318 = vst [vmem:[%s4061_s20 + $0x20] sm:$0xff] %v1307_v53  ;;  %v2030_v50 = vadd.f32 1e-08, %v1305_v16  ;;  %v5087_v24 = vld [vmem:[#allocation37_spill] sm:$0xff]  ;;  %v5089_v21 = vld [vmem:[#allocation20_spill] sm:$0xff] }
 0x153   : > { %5083 = vst [vmem:[#allocation33_spill] sm:$0xff] %v4080_v55  ;;  %v4094_v23 = vadd.f32 %v1886_v29, %v3954_v34  ;;  %v4096_v19 = vmin.f32 %v554_v7, %v619_v59  ;;  %v4099_v0 = vmul.f32 %v2666_v38, %v3835_v43  ;;  %1319 = vst [vmem:[%s4061_s20 + $0x28] sm:$0xff] %v1309_v41  ;;  %2667 = vlog2.f32 %v2027_v11  ;;  %v5088_v29 = vld [vmem:[#allocation19_spill] sm:$0xff]  ;;  %v5112_v55 = vld [vmem:[#allocation61_spill] sm:$0xff] }
 0x154   : > { %5084 = vst [vmem:[#allocation59_spill] sm:$0xff] %v4087_v28  ;;  %v4104_v14 = vadd.f32 %v3994_v3, %v3959_v35  ;;  %v4106_v8 = vmin.f32 %v555_v49, %v620_v1  ;;  %1320 = vst [vmem:[%s4061_s20 + $0x30] sm:$0xff] %v1311_v44  ;;  %v4109_v25 = vadd.f32 1e-08, %v1307_v53  ;;  %2669 = vlog2.f32 %v2028_v54  ;;  %v5093_v7 = vld [vmem:[#allocation39_spill] sm:$0xff]  ;;  %v5111_v28 = vld [vmem:[#allocation60_spill] sm:$0xff] }
 0x155   : > { %5085 = vst [vmem:[#allocation15_spill] sm:$0xff] %v4094_v23  ;;  %v4111_v58 = vmin.f32 %v556_v46, %v621_v42  ;;  %v4113_v34 = vmin.f32 %v557_v40, %v622_v13  ;;  %1321 = vst [vmem:[%s4061_s20 + $0x38] sm:$0xff] %v4099_v0  ;;  %v4117_v43 = vadd.f32 1e-08, %v1309_v41  ;;  %2671 = vlog2.f32 %v2029_v45  ;;  %v5090_v42 = vld [vmem:[#allocation21_spill] sm:$0xff]  ;;  %v5091_v40 = vld [vmem:[#allocation22_spill] sm:$0xff]  ;;  %s4683_s20 = scalar_lea.hbm %s4823_s8, %s2429_s23 }
 0x156   : > { %5086 = vst [vmem:[#allocation16_spill] sm:$0xff] %v4104_v14  ;;  %v738_v35 = vsub.f32 %v3825_v51, %v5087_v24  ;;  %v739_v3 = vsub.f32 %v3825_v51, %v5088_v29  ;;  %2673 = vlog2.f32 %v2030_v50  ;;  %v740_v61 = vsub.f32 %v3825_v51, %v5089_v21  ;;  %v5094_v46 = vld [vmem:[#allocation40_spill] sm:$0xff]  ;;  %v5113_v14 = vld [vmem:[#allocation41_spill] sm:$0xff] }
 0x157   : > { %v741_v13 = vsub.f32 %v3825_v51, %v5090_v42  ;;  %v742_v63 = vsub.f32 %v3825_v51, %v5091_v40  ;;  %v4129_v33 = vadd.f32 1e-08, %v1311_v44  ;;  %v743_v18 = vsub.f32 %v3825_v51, %v5092_v31 }
 0x158   : > { %v744_v37 = vsub.f32 %v3825_v51, %v5093_v7  ;;  %v745_v49 = vsub.f32 %v3825_v51, %v5094_v46  ;;  %v4138_v59 = vsub.f32 %v5073_v12, %v738_v35  ;;  %v4141_v1 = vsub.f32 %v5075_v52, %v739_v3 }
 0x159   : > { %v4144_v39 = vsub.f32 %v5076_v36, %v740_v61  ;;  %v4147_v16 = vsub.f32 %v5077_v47, %v741_v13  ;;  %v4150_v11 = vsub.f32 %v5078_v60, %v742_v63  ;;  %v4153_v53 = vsub.f32 %v5079_v62, %v743_v18 }
 0x15a   : > { %5095 = vst [vmem:[#allocation17_spill] sm:$0xff] %v4138_v59  ;;  %5096 = vst [vmem:[#allocation18_spill] sm:$0xff] %v4141_v1  ;;  %v4156_v54 = vsub.f32 %v5081_v20, %v744_v37  ;;  %v4159_v41 = vsub.f32 %v5082_v4, %v745_v49  ;;  %v4163_v45 = vadd.f32 %v3825_v51, %v5087_v24  ;;  %v4210_v18 = vmul.f32 0.6931472, %v5111_v28 }
 0x15b   : > { %5097 = vst [vmem:[#allocation34_spill] sm:$0xff] %v4144_v39  ;;  %5098 = vst [vmem:[#allocation35_spill] sm:$0xff] %v4147_v16  ;;  %v4167_v38 = vadd.f32 %v3825_v51, %v5088_v29  ;;  %v4171_v44 = vadd.f32 %v3825_v51, %v5089_v21  ;;  %v4175_v50 = vadd.f32 %v3825_v51, %v5090_v42  ;;  %v4213_v37 = vmul.f32 0.6931472, %v5112_v55 }
 0x15c   : > { %5099 = vst [vmem:[#allocation36_spill] sm:$0xff] %v4150_v11  ;;  %5100 = vst [vmem:[#allocation37_spill] sm:$0xff] %v4153_v53  ;;  %v4179_v35 = vadd.f32 %v3825_v51, %v5091_v40  ;;  %v4183_v3 = vadd.f32 %v3825_v51, %v5092_v31  ;;  %v4187_v61 = vadd.f32 %v3825_v51, %v5093_v7  ;;  %v5115_v63 = vmax.f32 %v3532_v2, -100.0 }
 0x15d   : > { %5101 = vst [vmem:[#allocation19_spill] sm:$0xff] %v4156_v54  ;;  %5102 = vst [vmem:[#allocation67_spill] sm:$0xff] %v4159_v41  ;;  %v4191_v13 = vadd.f32 %v3825_v51, %v5094_v46  ;;  %v1699_v23 = vsel %vm1696_vm8, %v5113_v14, %v3872_v26  ;;  %v5116_v28 = vmax.f32 %v3534_v32, -100.0  ;;  %v5119_v26 = vmax.f32 %v3881_v10, -100.0  ;;  %v5125_v41 = vld [vmem:[#allocation50_spill] sm:$0xff] }
 0x15e   : > { %5103 = vst [vmem:[#allocation68_spill] sm:$0xff] %v4163_v45  ;;  %5104 = vst [vmem:[#allocation69_spill] sm:$0xff] %v4167_v38  ;;  %2675 = vlog2.f32 %v4109_v25  ;;  %v4275_v25 = vadd.f32 %v4004_v9, %v3972_v57 }
 0x15f   : > { %5105 = vst [vmem:[#allocation70_spill] sm:$0xff] %v4171_v44  ;;  %5106 = vst [vmem:[#allocation71_spill] sm:$0xff] %v4175_v50  ;;  %v1713_v14 = vrot.slane %v5119_v26, 5  ;;  %v5124_v50 = vld [vmem:[#allocation47_spill] sm:$0xff]  ;;  %2677 = vlog2.f32 %v4117_v43 }
 0x160   : > { %5107 = vst [vmem:[#allocation72_spill] sm:$0xff] %v4179_v35  ;;  %5108 = vst [vmem:[#allocation73_spill] sm:$0xff] %v4183_v3  ;;  %v5114_v3 = vld [vmem:[#allocation42_spill] sm:$0xff]  ;;  %v4227_v55 = vpop.eup %2667  ;;  %v5118_v35 = vmax.f32 %v3865_v48, -100.0  ;;  %2679 = vlog2.f32 %v4129_v33  ;;  %v5136_v33 = vmax.f32 %v3532_v2, -100.0  ;;  %v5147_v2 = vmax.f32 %v3881_v10, -100.0 }
 0x161   : > { %5109 = vst [vmem:[#allocation74_spill] sm:$0xff] %v4187_v61  ;;  %5110 = vst [vmem:[#allocation75_spill] sm:$0xff] %v4191_v13  ;;  %v1702_v51 = vsel %vm1696_vm8, %v5114_v3, %v3888_v22  ;;  %v1704_v13 = vrot.slane %v5115_v63, 5  ;;  %v1707_v61 = vrot.slane %v5116_v28, 5  ;;  %v4235_v38 = vpop.eup %2669  ;;  %v5121_v22 = vld [vmem:[#allocation43_spill] sm:$0xff]  ;;  %v5122_v63 = vld [vmem:[#allocation46_spill] sm:$0xff]  ;;  %v1714_v26 = vsel %vm1696_vm8, %v5125_v41, %v1713_v14 }
 0x162   : > { %5117 = vst [vmem:[#allocation60_spill] sm:$0xff] %v4227_v55  ;;  %v1710_v44 = vrot.slane %v5118_v35, 5  ;;  %5120 = vst [vmem:[#allocation61_spill] sm:$0xff] %v4235_v38  ;;  %v1730_v55 = vsel %vm1729_vm9, %v1699_v23, 0.0  ;;  %v1737_v49 = vsel %vm1729_vm9, %v1702_v51, 0.0  ;;  %v4243_v45 = vpop.eup %2671  ;;  %v5126_v38 = vmax.f32 %v4210_v18, -100.0 }
 0x163   : > { %v1705_v3 = vsel %vm1696_vm8, %v5121_v22, %v1704_v13  ;;  %v1708_v28 = vsel %vm1696_vm8, %v5122_v63, %v1707_v61  ;;  %5123 = vst [vmem:[#allocation41_spill] sm:$0xff] %v4243_v45  ;;  %v5127_v13 = vmax.f32 %v4213_v37, -100.0  ;;  %v4253_v53 = vpop.eup %2673  ;;  %v1731_v61 = vrot.slane %v1730_v55, 4  ;;  %v5129_v45 = vld [vmem:[#allocation52_spill] sm:$0xff]  ;;  %v5158_v10 = vld [vmem:[#allocation62_spill] sm:$0xff] }
 0x164   : > { %v1711_v35 = vsel %vm1696_vm8, %v5124_v50, %v1710_v44  ;;  %v1716_v54 = vrot.slane %v5126_v38, 5  ;;  %5128 = vst [vmem:[#allocation42_spill] sm:$0xff] %v4253_v53  ;;  %v1738_v23 = vrot.slane %v1737_v49, 4  ;;  %v1744_v51 = vsel %vm1729_vm9, %v1705_v3, 0.0  ;;  %v5130_v50 = vld [vmem:[#allocation55_spill] sm:$0xff] }
 0x165   : > { %v1719_v22 = vrot.slane %v5127_v13, 5  ;;  %v1751_v63 = vsel %vm1729_vm9, %v1708_v28, 0.0  ;;  %v1745_v14 = vrot.slane %v1744_v51, 4  ;;  %v1732_v38 = vadd.f32 %v1731_v61, %v1730_v55 }
 0x166   : > { %v1717_v44 = vsel %vm1696_vm8, %v5129_v45, %v1716_v54  ;;  %v1752_v11 = vrot.slane %v1751_v63, 4  ;;  %v1739_v16 = vadd.f32 %v1738_v23, %v1737_v49  ;;  %v1758_v13 = vsel %vm1729_vm9, %v1711_v35, 0.0 }
 0x167   : > { %v1720_v41 = vsel %vm1696_vm8, %v5130_v50, %v1719_v22  ;;  %v1765_v53 = vsel %vm1729_vm9, %v1714_v26, 0.0  ;;  %v1746_v39 = vadd.f32 %v1745_v14, %v1744_v51  ;;  %v1759_v59 = vrot.slane %v1758_v13, 4 }
 0x168   : > { %v1753_v1 = vadd.f32 %v1752_v11, %v1751_v63  ;;  %v1766_v3 = vrot.slane %v1765_v53, 4  ;;  %v1733_v46 = vrot.slane %v1732_v38, 2  ;;  %v1740_v28 = vrot.slane %v1739_v16, 2 }
 0x169   : > { %v1772_v7 = vsel %vm1729_vm9, %v1717_v44, 0.0  ;;  %v1779_v54 = vsel %vm1729_vm9, %v1720_v41, 0.0  ;;  %v1747_v45 = vrot.slane %v1746_v39, 2  ;;  %v1760_v50 = vadd.f32 %v1759_v59, %v1758_v13 }
 0x16a   : > { %v1754_v22 = vrot.slane %v1753_v1, 2  ;;  %v1767_v31 = vadd.f32 %v1766_v3, %v1765_v53  ;;  %v1734_v55 = vadd.f32 %v1733_v46, %v1732_v38  ;;  %v1741_v49 = vadd.f32 %v1740_v28, %v1739_v16  ;;  %v5131_v38 = vld [vmem:[#allocation66_spill] sm:$0xff]  ;;  %v5137_v28 = vld [vmem:[#allocation23_spill] sm:$0xff] }
 0x16b   : > { %v1773_v61 = vrot.slane %v1772_v7, 4  ;;  %v1780_v35 = vrot.slane %v1779_v54, 4  ;;  %v1748_v23 = vadd.f32 %v1747_v45, %v1746_v39  ;;  %v1761_v51 = vrot.slane %v1760_v50, 2  ;;  %v5140_v45 = vld [vmem:[#allocation24_spill] sm:$0xff] }
 0x16c   : > { %v1755_v26 = vadd.f32 %v1754_v22, %v1753_v1  ;;  %v1768_v11 = vrot.slane %v1767_v31, 2  ;;  %v2034_v63 = vadd.f32 1e-08, %v4099_v0  ;;  %v1735_v40 = vrot.slane %v1734_v55, 1 }
 0x16d   : > { %v1774_v14 = vadd.f32 %v1773_v61, %v1772_v7  ;;  %v1781_v44 = vadd.f32 %v1780_v35, %v1779_v54  ;;  %v1742_v41 = vrot.slane %v1741_v49, 1  ;;  %v1762_v42 = vadd.f32 %v1761_v51, %v1760_v50 }
 0x16e   : > { %v1769_v21 = vadd.f32 %v1768_v11, %v1767_v31  ;;  %v1749_v59 = vrot.slane %v1748_v23, 1  ;;  %v1756_v53 = vrot.slane %v1755_v26, 1  ;;  %v4270_v1 = vadd.f32 %v3999_v15, %v3967_v6 }
 0x16f   : > { %v1775_v46 = vrot.slane %v1774_v14, 2  ;;  %v1782_v16 = vrot.slane %v1781_v44, 2  ;;  %v1763_v39 = vrot.slane %v1762_v42, 1  ;;  %2681 = vlog2.f32 %v2034_v63 }
 0x170   : > { %v1770_v0 = vrot.slane %v1769_v21, 1  ;;  %v4279_v13 = vadd.f32 %v5131_v38, %v3977_v5  ;;  %v4281_v43 = vadd.f32 %v1735_v40, %v1734_v55  ;;  %v4283_v3 = vadd.f32 %v1742_v41, %v1741_v49  ;;  %v5145_v49 = vld [vmem:[#allocation25_spill] sm:$0xff] }
 0x171   : > { %v1776_v7 = vadd.f32 %v1775_v46, %v1774_v14  ;;  %v1783_v31 = vadd.f32 %v1782_v16, %v1781_v44  ;;  %v4285_v6 = vadd.f32 %v1749_v59, %v1748_v23  ;;  %v4287_v15 = vadd.f32 %v1756_v53, %v1755_v26  ;;  %v5148_v23 = vld [vmem:[#allocation26_spill] sm:$0xff]  ;;  %v5154_v44 = vld [vmem:[#allocation29_spill] sm:$0xff]  ;;  %v5159_v16 = vld [vmem:[#allocation64_spill] sm:$0xff] }
 0x172   : > { %5132 = vst [vmem:[#allocation43_spill] sm:$0xff] %v4281_v43  ;;  %5133 = vst [vmem:[#allocation46_spill] sm:$0xff] %v4283_v3  ;;  %v5138_v57 = vmax.f32 %v5137_v28, -100.0  ;;  %v5139_v54 = vmax.f32 %v3534_v32, -100.0  ;;  %v5141_v22 = vmax.f32 %v5140_v45, -100.0  ;;  %v4301_v40 = vadd.f32 %v1763_v39, %v1762_v42  ;;  %v5151_v42 = vld [vmem:[#allocation28_spill] sm:$0xff] }
 0x173   : > { %5134 = vst [vmem:[#allocation47_spill] sm:$0xff] %v4285_v6  ;;  %5135 = vst [vmem:[#allocation50_spill] sm:$0xff] %v4287_v15  ;;  %v4303_v50 = vadd.f32 %v1770_v0, %v1769_v21  ;;  %v5144_v55 = vmax.f32 %v3865_v48, -100.0  ;;  %v5146_v61 = vmax.f32 %v5145_v49, -100.0  ;;  %v5149_v26 = vmax.f32 %v5148_v23, -100.0  ;;  %v5157_v53 = vld [vmem:[#allocation14_spill] sm:$0xff] }
 0x174   : > { %v4293_v9 = vsub.f32 %v5138_v57, %v5136_v33  ;;  %v4299_v5 = vsub.f32 %v5141_v22, %v5139_v54  ;;  %5142 = vst [vmem:[#allocation52_spill] sm:$0xff] %v4301_v40  ;;  %v1777_v32 = vrot.slane %v1776_v7, 1  ;;  %v1784_v11 = vrot.slane %v1783_v31, 1  ;;  %v5160_v0 = vld [vmem:[#allocation57_spill] sm:$0xff]  ;;  %v5161_v22 = vld [vmem:[#allocation27_spill] sm:$0xff]  ;;  %v5177_v6 = vld [vmem:[#allocation32_spill] sm:$0xff] }
 0x175   : > { %5143 = vst [vmem:[#allocation55_spill] sm:$0xff] %v4303_v50  ;;  %v4309_v35 = vsub.f32 %v5146_v61, %v5144_v55  ;;  %v4315_v51 = vsub.f32 %v5149_v26, %v5147_v2  ;;  %v5150_v63 = vmax.f32 %v4210_v18, -100.0  ;;  %v5152_v14 = vmax.f32 %v5151_v42, -100.0  ;;  %v5162_v55 = vld [vmem:[#allocation56_spill] sm:$0xff]  ;;  %v5164_v2 = vld [vmem:[#allocation10_spill] sm:$0xff]  ;;  %v5170_v39 = vld [vmem:[#allocation13_spill] sm:$0xff] }
 0x176   : > { %v5153_v48 = vmax.f32 %v4213_v37, -100.0  ;;  %v5155_v41 = vmax.f32 %v5154_v44, -100.0  ;;  %v603_v38 = vsub.f32 %v5073_v12, %v5160_v0  ;;  %v604_v18 = vsub.f32 %v5075_v52, %v5160_v0  ;;  %v5172_v50 = vld [vmem:[#allocation30_spill] sm:$0xff]  ;;  %v5175_v15 = vld [vmem:[#allocation31_spill] sm:$0xff] }
 0x177   : > { %v4321_v21 = vsub.f32 %v5152_v14, %v5150_v63  ;;  %v605_v33 = vsub.f32 %v5076_v36, %v5160_v0  ;;  %v606_v37 = vsub.f32 %v5077_v47, %v5160_v0  ;;  %v607_v28 = vsub.f32 %v5078_v60, %v5160_v0  ;;  %v5166_v63 = vld [vmem:[#allocation11_spill] sm:$0xff] }
 0x178   : > { %v4327_v59 = vsub.f32 %v5155_v41, %v5153_v48  ;;  %v608_v57 = vsub.f32 %v5079_v62, %v5160_v0  ;;  %v609_v54 = vsub.f32 %v5081_v20, %v5160_v0  ;;  %v610_v45 = vsub.f32 %v5082_v4, %v5160_v0  ;;  %v5168_v48 = vld [vmem:[#allocation12_spill] sm:$0xff]  ;;  %v5210_v3 = vld [vmem:[#allocation35_spill] sm:$0xff] }
 0x179   : > { %v5163_v49 = vsub.f32 %v5161_v22, %v5162_v55  ;;  %v5165_v23 = vsub.f32 %v5164_v2, %v5162_v55  ;;  %v5167_v42 = vsub.f32 %v5166_v63, %v5162_v55  ;;  %v5169_v44 = vsub.f32 %v5168_v48, %v5162_v55 }
 0x17a   : > { %5156 = vst [vmem:[#allocation66_spill] sm:$0xff] %v4327_v59  ;;  %v5171_v46 = vsub.f32 %v5170_v39, %v5162_v55  ;;  %v5173_v40 = vsub.f32 %v5172_v50, %v5162_v55  ;;  %v5211_v59 = vld [vmem:[#allocation36_spill] sm:$0xff] }
 0x17b   : > { %v623_v61 = vmin.f32 %v5163_v49, %v603_v38  ;;  %v624_v26 = vmin.f32 %v5165_v23, %v604_v18  ;;  %v625_v14 = vmin.f32 %v5167_v42, %v605_v33  ;;  %v626_v41 = vmin.f32 %v5169_v44, %v606_v37  ;;  %v4367_v49 = vpop.eup %2675 }
 0x17c   : > { %v627_v0 = vmin.f32 %v5171_v46, %v607_v28  ;;  %v628_v38 = vmin.f32 %v5173_v40, %v608_v57  ;;  %5174 = vst [vmem:[#allocation23_spill] sm:$0xff] %v4367_v49  ;;  %v5176_v18 = vsub.f32 %v5175_v15, %v5162_v55  ;;  %v5178_v33 = vsub.f32 %v5177_v6, %v5162_v55  ;;  %v4387_v55 = vpop.eup %2677 }
 0x17d   : > { %v639_v37 = vmin.f32 %v623_v61, %v4073_v27  ;;  %v640_v44 = vmin.f32 %v624_v26, %v4075_v17  ;;  %v641_v46 = vmin.f32 %v625_v14, %v4082_v56  ;;  %v642_v28 = vmin.f32 %v626_v41, %v4089_v30  ;;  %5179 = vst [vmem:[#allocation24_spill] sm:$0xff] %v4387_v55  ;;  %v5186_v14 = vld [vmem:[#allocation21_spill] sm:$0xff] }
 0x17e   : > { %v629_v23 = vmin.f32 %v5176_v18, %v609_v54  ;;  %v630_v42 = vmin.f32 %v5178_v33, %v610_v45  ;;  %v643_v40 = vmin.f32 %v627_v0, %v4096_v19  ;;  %v644_v57 = vmin.f32 %v628_v38, %v4106_v8  ;;  %v4397_v8 = vpop.eup %2679  ;;  %v5187_v0 = vld [vmem:[#allocation22_spill] sm:$0xff]  ;;  %v5189_v33 = vld [vmem:[#allocation39_spill] sm:$0xff] }
 0x17f   : > { %v4389_v17 = vadd.f32 %v1777_v32, %v1776_v7  ;;  %v4391_v56 = vadd.f32 %v1784_v11, %v1783_v31  ;;  %5182 = vst [vmem:[#allocation28_spill] sm:$0xff] %v4397_v8  ;;  %v4407_v32 = vpop.eup %2681  ;;  %v5185_v11 = vld [vmem:[#allocation20_spill] sm:$0xff]  ;;  %v5188_v18 = vld [vmem:[#allocation38_spill] sm:$0xff]  ;;  %vm4433_vm10 = vcmp.gt.f32.partialorder %v639_v37, 0.0  ;;  %vm4437_vm11 = vcmp.gt.f32.partialorder %v640_v44, 0.0 }
 0x180   : > { %v645_v45 = vmin.f32 %v629_v23, %v4111_v58  ;;  %v646_v27 = vmin.f32 %v630_v42, %v4113_v34  ;;  %v5183_v34 = vld [vmem:[#allocation63_spill] sm:$0xff]  ;;  %5184 = vst [vmem:[#allocation29_spill] sm:$0xff] %v4407_v32  ;;  %v5190_v58 = vld [vmem:[#allocation40_spill] sm:$0xff]  ;;  %vm4449_vm12 = vcmp.gt.f32.partialorder %v641_v46, 0.0  ;;  %vm4453_vm13 = vcmp.gt.f32.partialorder %v642_v28, 0.0 }
 0x181   : > { %5180 = vst [vmem:[#allocation25_spill] sm:$0xff] %v4389_v17  ;;  %5181 = vst [vmem:[#allocation26_spill] sm:$0xff] %v4391_v56  ;;  %v702_v7 = vsub.f32 %v5183_v34, %v5087_v24  ;;  %v703_v31 = vsub.f32 %v5183_v34, %v5088_v29  ;;  %v704_v26 = vsub.f32 %v5183_v34, %v5185_v11  ;;  %vm4457_vm14 = vcmp.gt.f32.partialorder %v643_v40, 0.0 }
 0x182   : > { %v705_v41 = vsub.f32 %v5183_v34, %v5186_v14  ;;  %v706_v38 = vsub.f32 %v5183_v34, %v5187_v0  ;;  %v707_v23 = vsub.f32 %v5183_v34, %v5188_v18  ;;  %v708_v42 = vsub.f32 %v5183_v34, %v5189_v33 }
 0x183   : > { %v709_v61 = vsub.f32 %v5183_v34, %v5190_v58  ;;  %v710_v19 = vsub.f32 %v5161_v22, %v702_v7  ;;  %v711_v30 = vsub.f32 %v5164_v2, %v703_v31  ;;  %v712_v54 = vsub.f32 %v5166_v63, %v704_v26 }
 0x184   : > { %v713_v49 = vsub.f32 %v5168_v48, %v705_v41  ;;  %v714_v32 = vsub.f32 %v5170_v39, %v706_v38  ;;  %v715_v8 = vsub.f32 %v5172_v50, %v707_v23  ;;  %v716_v55 = vsub.f32 %v5175_v15, %v708_v42 }
 0x185   : > { %v717_v56 = vsub.f32 %v5177_v6, %v709_v61  ;;  %v718_v17 = vadd.f32 %v5087_v24, %v5183_v34  ;;  %v719_v7 = vadd.f32 %v5088_v29, %v5183_v34  ;;  %v720_v41 = vadd.f32 %v5185_v11, %v5183_v34  ;;  %v1953_v11 = vpop.permute.xlu1 %1952 }
 0x186   : > { %v721_v61 = vadd.f32 %v5186_v14, %v5183_v34  ;;  %v722_v24 = vadd.f32 %v5187_v0, %v5183_v34  ;;  %v723_v29 = vadd.f32 %v5188_v18, %v5183_v34  ;;  %vm4461_vm15 = vcmp.gt.f32.partialorder %v644_v57, 0.0 }
 0x187   : > { %v724_v14 = vadd.f32 %v5189_v33, %v5183_v34  ;;  %v725_v46 = vadd.f32 %v5190_v58, %v5183_v34  ;;  %v726_v0 = vsub.f32 %v718_v17, %v5161_v22  ;;  %v727_v28 = vsub.f32 %v719_v7, %v5164_v2  ;;  %v5208_v34 = vld [vmem:[#allocation18_spill] sm:$0xff] }
 0x188   : > { %vm4471_vm0 = vcmp.gt.f32.partialorder %v645_v45, 0.0  ;;  %vm4475_vm1 = vcmp.gt.f32.partialorder %v646_v27, 0.0  ;;  %v728_v57 = vsub.f32 %v720_v41, %v5166_v63  ;;  %v729_v23 = vsub.f32 %v721_v61, %v5168_v48  ;;  %v5207_v45 = vld [vmem:[#allocation17_spill] sm:$0xff]  ;;  %v5209_v27 = vld [vmem:[#allocation34_spill] sm:$0xff]  ;;  %v5213_v61 = vld [vmem:[#allocation19_spill] sm:$0xff] }
 0x189   : > { %v730_v33 = vsub.f32 %v722_v24, %v5170_v39  ;;  %v731_v58 = vsub.f32 %v723_v29, %v5172_v50  ;;  %v732_v22 = vsub.f32 %v724_v14, %v5175_v15  ;;  %v733_v2 = vsub.f32 %v725_v46, %v5177_v6  ;;  %v5212_v41 = vld [vmem:[#allocation37_spill] sm:$0xff]  ;;  %v5214_v24 = vld [vmem:[#allocation67_spill] sm:$0xff]  ;;  %v5215_v29 = vld [vmem:[#allocation68_spill] sm:$0xff] }
 0x18a   : > { %v770_v17 = vmin.f32 %v710_v19, %v5207_v45  ;;  %v771_v42 = vmin.f32 %v711_v30, %v5208_v34  ;;  %v772_v7 = vmin.f32 %v712_v54, %v5209_v27  ;;  %v773_v43 = vmin.f32 %v713_v49, %v5210_v3  ;;  %v5217_v14 = vld [vmem:[#allocation69_spill] sm:$0xff]  ;;  %v5219_v46 = vld [vmem:[#allocation70_spill] sm:$0xff]  ;;  %v5221_v49 = vld [vmem:[#allocation71_spill] sm:$0xff] }
 0x18b   : > { %v774_v63 = vmin.f32 %v714_v32, %v5211_v59  ;;  %v775_v48 = vmin.f32 %v715_v8, %v5212_v41  ;;  %v776_v39 = vmin.f32 %v716_v55, %v5213_v61  ;;  %v777_v50 = vmin.f32 %v717_v56, %v5214_v24  ;;  %v5223_v32 = vld [vmem:[#allocation72_spill] sm:$0xff]  ;;  %v5225_v45 = vld [vmem:[#allocation73_spill] sm:$0xff]  ;;  %v5227_v34 = vld [vmem:[#allocation74_spill] sm:$0xff] }
 0x18c   : > { %v5216_v15 = vsub.f32 %v5215_v29, %v5073_v12  ;;  %v5218_v19 = vsub.f32 %v5217_v14, %v5075_v52  ;;  %v5220_v54 = vsub.f32 %v5219_v46, %v5076_v36  ;;  %v5222_v59 = vsub.f32 %v5221_v49, %v5077_v47  ;;  %v5229_v27 = vld [vmem:[#allocation75_spill] sm:$0xff]  ;;  %v5240_v49 = vld [vmem:[#allocation16_spill] sm:$0xff] }
 0x18d   : > { %v5224_v55 = vsub.f32 %v5223_v32, %v5078_v60  ;;  %v5226_v12 = vsub.f32 %v5225_v45, %v5079_v62  ;;  %v5228_v52 = vsub.f32 %v5227_v34, %v5081_v20  ;;  %v5230_v36 = vsub.f32 %v5229_v27, %v5082_v4  ;;  %v5236_v14 = vld [vmem:[#allocation59_spill] sm:$0xff] }
 0x18e   : > { %v778_v6 = vmin.f32 %v726_v0, %v5216_v15  ;;  %v779_v30 = vmin.f32 %v727_v28, %v5218_v19  ;;  %v780_v3 = vmin.f32 %v728_v57, %v5220_v54  ;;  %v781_v8 = vmin.f32 %v729_v23, %v5222_v59  ;;  %v5235_v15 = vld [vmem:[#allocation45_spill] sm:$0xff]  ;;  %v5238_v46 = vld [vmem:[#allocation15_spill] sm:$0xff]  ;;  %v5239_v54 = vld [vmem:[#allocation48_spill] sm:$0xff] }
 0x18f   : > { %v782_v56 = vmin.f32 %v730_v33, %v5224_v55  ;;  %v783_v0 = vmin.f32 %v731_v58, %v5226_v12  ;;  %v784_v28 = vmin.f32 %v732_v22, %v5228_v52  ;;  %v785_v57 = vmin.f32 %v733_v2, %v5230_v36  ;;  %v5237_v19 = vld [vmem:[#allocation65_spill] sm:$0xff]  ;;  %v5242_v32 = vld [vmem:[#allocation51_spill] sm:$0xff]  ;;  %v5244_v12 = vld [vmem:[#allocation54_spill] sm:$0xff] }
 0x190   : > { %v786_v41 = vmin.f32 %v770_v17, %v778_v6  ;;  %v787_v61 = vmin.f32 %v771_v42, %v779_v30  ;;  %v788_v47 = vmin.f32 %v772_v7, %v780_v3  ;;  %v789_v23 = vmin.f32 %v773_v43, %v781_v8  ;;  %v5241_v59 = vld [vmem:[#allocation49_spill] sm:$0xff] }
 0x191   : > { %v790_v24 = vmin.f32 %v774_v63, %v782_v56  ;;  %v791_v29 = vmin.f32 %v775_v48, %v783_v0  ;;  %v792_v60 = vmin.f32 %v776_v39, %v784_v28  ;;  %v793_v33 = vmin.f32 %v777_v50, %v785_v57  ;;  %v5232_v63 = vld [vmem:[#allocation58_spill] sm:$0xff]  ;;  %v5233_v48 = vld [vmem:[#allocation44_spill] sm:$0xff]  ;;  %v5234_v50 = vld [vmem:[#allocation33_spill] sm:$0xff] }
 0x192   : > { %vm794_vm2 = vcmp.gt.f32.partialorder %v786_v41, 0.0  ;;  %vm795_vm3 = vcmp.gt.f32.partialorder %v787_v61, 0.0  ;;  %vm796_vm4 = vcmp.gt.f32.partialorder %v788_v47, 0.0  ;;  %vm797_vm5 = vcmp.gt.f32.partialorder %v789_v23, 0.0  ;;  %v5243_v56 = vld [vmem:[#allocation53_spill] sm:$0xff]  ;;  %v5252_v23 = vld [vmem:[#allocation66_spill] sm:$0xff] }
 0x193   : > { %vm798_vm6 = vcmp.gt.f32.partialorder %v790_v24, 0.0  ;;  %vm799_vm7 = vcmp.gt.f32.partialorder %v791_v29, 0.0  ;;  %vm800_vm8 = vcmp.gt.f32.partialorder %v792_v60, 0.0  ;;  %vm801_vm9 = vcmp.gt.f32.partialorder %v793_v33, 0.0 }
 0x194   : > { %v5231_v62 = vmov 0.0   ;;  %v1943_v39 = vadd.f32 %v5233_v48, %v5232_v63  ;;  %v1944_v6 = vadd.f32 %v5235_v15, %v5234_v50  ;;  %v1945_v30 = vadd.f32 %v5237_v19, %v5236_v14  ;;  %v5254_v50 = vld [vmem:[#allocation43_spill] sm:$0xff] }
 0x195   : > { %v4520_v4 = vsel %vm4433_vm10, 1.0, %v5231_v62  ;;  %v4525_v20 = vsel %vm4437_vm11, 1.0, %v5231_v62  ;;  %v4530_v43 = vsel %vm4449_vm12, 1.0, %v5231_v62  ;;  %v4535_v58 = vsel %vm4453_vm13, 1.0, %v5231_v62  ;;  %v5256_v19 = vld [vmem:[#allocation47_spill] sm:$0xff] }
 0x196   : > { %v4540_v31 = vsel %vm4457_vm14, 1.0, %v5231_v62  ;;  %v4545_v26 = vsel %vm4461_vm15, 1.0, %v5231_v62  ;;  %v4550_v37 = vsel %vm4471_vm0, 1.0, %v5231_v62  ;;  %v4555_v44 = vsel %vm4475_vm1, 1.0, %v5231_v62 }
 0x197   : > { %v2398_v38 = vsel %vm794_vm2, 1.0, %v5231_v62  ;;  %v4561_v22 = vsel %vm795_vm3, 1.0, %v5231_v62  ;;  %v4565_v2 = vsel %vm796_vm4, 1.0, %v5231_v62  ;;  %v4569_v18 = vsel %vm797_vm5, 1.0, %v5231_v62 }
 0x198   : > { %v4573_v40 = vsel %vm798_vm6, 1.0, %v5231_v62  ;;  %v4577_v17 = vsel %vm799_vm7, 1.0, %v5231_v62  ;;  %v4581_v42 = vsel %vm800_vm8, 1.0, %v5231_v62  ;;  %v4585_v7 = vsel %vm801_vm9, 1.0, %v5231_v62 }
 0x199   : > { %v1946_v3 = vadd.f32 %v5239_v54, %v5238_v46  ;;  %v1947_v8 = vadd.f32 %v5241_v59, %v5240_v49  ;;  %v1948_v55 = vadd.f32 %v5242_v32, %v4270_v1  ;;  %v1949_v45 = vadd.f32 %v5243_v56, %v4275_v25  ;;  %v5258_v49 = vld [vmem:[#allocation52_spill] sm:$0xff] }
 0x19a   : > { %v1950_v0 = vadd.f32 %v5244_v12, %v4279_v13  ;;  %v5245_v34 = vrot.slane %v5158_v10, %v5157_v53  ;;  %v5246_v28 = vrot.slane %v5159_v16, %v5157_v53  ;;  %v5247_v36 = vrot.slane %v4293_v9, %v5157_v53 }
 0x19b   : > { %v5248_v1 = vrot.slane %v4299_v5, %v5157_v53  ;;  %v5249_v25 = vrot.slane %v4309_v35, %v5157_v53  ;;  %v5250_v10 = vrot.slane %v4315_v51, %v5157_v53  ;;  %v5251_v16 = vrot.slane %v4321_v21, %v5157_v53  ;;  %v5255_v51 = vld [vmem:[#allocation46_spill] sm:$0xff] }
 0x19c   : > { %v1987_v52 = vmul.f32 %v5245_v34, %v1953_v11  ;;  %v1988_v27 = vmul.f32 %v5246_v28, %v1953_v11  ;;  %v1989_v57 = vmul.f32 %v5247_v36, %v1953_v11  ;;  %v5253_v9 = vrot.slane %v5252_v23, %v5157_v53  ;;  %v5257_v21 = vld [vmem:[#allocation50_spill] sm:$0xff]  ;;  %v5259_v53 = vld [vmem:[#allocation55_spill] sm:$0xff] }
 0x19d   : > { %v1990_v41 = vmul.f32 %v5248_v1, %v1953_v11  ;;  %v1991_v13 = vmul.f32 %v5249_v25, %v1953_v11  ;;  %v1992_v61 = vmul.f32 %v5250_v10, %v1953_v11  ;;  %v1993_v47 = vmul.f32 %v5251_v16, %v1953_v11 }
 0x19e   : > { %v1994_v24 = vmul.f32 %v5253_v9, %v1953_v11  ;;  %v1995_v29 = vadd.f32 %v1987_v52, %v1943_v39  ;;  %v1996_v60 = vadd.f32 %v1988_v27, %v1944_v6  ;;  %v1997_v5 = vadd.f32 %v1989_v57, %v1945_v30  ;;  %v5260_v39 = vld [vmem:[#allocation25_spill] sm:$0xff]  ;;  %v5261_v30 = vld [vmem:[#allocation26_spill] sm:$0xff] }
 0x19f   : > { %v1998_v33 = vadd.f32 %v1990_v41, %v1946_v3  ;;  %v1999_v62 = vadd.f32 %v1991_v13, %v1947_v8  ;;  %v2000_v63 = vadd.f32 %v1992_v61, %v1948_v55  ;;  %v2001_v35 = vadd.f32 %v1993_v47, %v1949_v45  ;;  %v5262_v13 = vld [vmem:[#allocation60_spill] sm:$0xff]  ;;  %v5263_v61 = vld [vmem:[#allocation61_spill] sm:$0xff]  ;;  %v5265_v9 = vld [vmem:[#allocation42_spill] sm:$0xff] }
 0x1a0   : > { %v2002_v48 = vadd.f32 %v1994_v24, %v1950_v0  ;;  %v2003_v15 = vadd.f32 %v1995_v29, %v5254_v50  ;;  %v2004_v14 = vadd.f32 %v1996_v60, %v5255_v51  ;;  %v2005_v46 = vadd.f32 %v1997_v5, %v5256_v19  ;;  %v5264_v47 = vld [vmem:[#allocation41_spill] sm:$0xff]  ;;  %v5266_v29 = vld [vmem:[#allocation23_spill] sm:$0xff] }
 0x1a1   : > { %v2006_v54 = vadd.f32 %v1998_v33, %v5257_v21  ;;  %v2007_v59 = vadd.f32 %v1999_v62, %v5258_v49  ;;  %v2008_v11 = vadd.f32 %v2000_v63, %v5259_v53  ;;  %v2009_v6 = vadd.f32 %v2001_v35, %v5260_v39  ;;  %v5267_v33 = vld [vmem:[#allocation24_spill] sm:$0xff] }
 0x1a2   : > { %v2010_v3 = vadd.f32 %v2002_v48, %v5261_v30  ;;  %v2011_v8 = vsub.f32 0.0, %v2003_v15  ;;  %v2012_v32 = vsub.f32 0.0, %v2004_v14  ;;  %v2013_v55 = vsub.f32 0.0, %v2005_v46  ;;  %v5268_v63 = vld [vmem:[#allocation28_spill] sm:$0xff]  ;;  %v5269_v48 = vld [vmem:[#allocation29_spill] sm:$0xff] }
 0x1a3   : > { %v2014_v56 = vsub.f32 0.0, %v2006_v54  ;;  %v2015_v45 = vsub.f32 0.0, %v2007_v59  ;;  %v2016_v12 = vsub.f32 0.0, %v2008_v11  ;;  %v2017_v0 = vsub.f32 0.0, %v2009_v6 }
 0x1a4   : > { %v2018_v34 = vsub.f32 0.0, %v2010_v3  ;;  %v2019_v52 = vmul.f32 %v2398_v38, %v4520_v4  ;;  %v2020_v28 = vmul.f32 %v4561_v22, %v4525_v20  ;;  %v2021_v27 = vmul.f32 %v4565_v2, %v4530_v43 }
 0x1a5   : > { %v2022_v36 = vmul.f32 %v4569_v18, %v4535_v58  ;;  %v2023_v57 = vmul.f32 %v4573_v40, %v4540_v31  ;;  %v2024_v1 = vmul.f32 %v4577_v17, %v4545_v26  ;;  %v2025_v41 = vmul.f32 %v4581_v42, %v4550_v37 }
 0x1a6   : > { %v2026_v25 = vmul.f32 %v4585_v7, %v4555_v44  ;;  %v2036_v10 = vmul.f32 0.6931472, %v5262_v13  ;;  %v2038_v16 = vmul.f32 0.6931472, %v5263_v61  ;;  %v2040_v23 = vmul.f32 0.6931472, %v5264_v47 }
 0x1a7   : > { %v2042_v24 = vmul.f32 0.6931472, %v5265_v9  ;;  %v2044_v60 = vmul.f32 0.6931472, %v5266_v29  ;;  %v4656_v5 = vmax.f32 %v4520_v4, %v2398_v38  ;;  %v2046_v62 = vmul.f32 0.6931472, %v5267_v33 }
 0x1a8   : > { %v2048_v35 = vmul.f32 0.6931472, %v5268_v63  ;;  %v2050_v50 = vmul.f32 0.6931472, %v5269_v48  ;;  %v4663_v15 = vmax.f32 %v4525_v20, %v4561_v22  ;;  %v2051_v51 = vsub.f32 0.0, %v2036_v10 }
 0x1a9   : > { %v2052_v14 = vsub.f32 0.0, %v2038_v16  ;;  %v2053_v19 = vsub.f32 0.0, %v2040_v23  ;;  %v2054_v46 = vsub.f32 0.0, %v2042_v24  ;;  %v2055_v21 = vsub.f32 0.0, %v2044_v60 }
 0x1aa   : > { %v2056_v54 = vsub.f32 0.0, %v2046_v62  ;;  %v2057_v49 = vsub.f32 0.0, %v2048_v35  ;;  %v2058_v59 = vsub.f32 0.0, %v2050_v50  ;;  %v2059_v4 = vmul.f32 3.0, %v2051_v51 }
 0x1ab   : > { %v2060_v38 = vmul.f32 3.0, %v2052_v14  ;;  %v2061_v53 = vmul.f32 3.0, %v2053_v19  ;;  %v2062_v11 = vmul.f32 3.0, %v2054_v46  ;;  %v2063_v39 = vmul.f32 3.0, %v2055_v21 }
 0x1ac   : > { %v2064_v6 = vmul.f32 3.0, %v2056_v54  ;;  %v2065_v30 = vmul.f32 3.0, %v2057_v49  ;;  %v2066_v3 = vmul.f32 3.0, %v2058_v59  ;;  %v2067_v13 = vadd.f32 %v2059_v4, %v2011_v8 }
 0x1ad   : > { %v2068_v20 = vadd.f32 %v2060_v38, %v2012_v32  ;;  %v2069_v22 = vadd.f32 %v2061_v53, %v2013_v55  ;;  %v2070_v10 = vadd.f32 %v2062_v11, %v2014_v56  ;;  %v2071_v61 = vadd.f32 %v2063_v39, %v2015_v45 }
 0x1ae   : > { %v2072_v16 = vadd.f32 %v2064_v6, %v2016_v12  ;;  %v2073_v47 = vadd.f32 %v2065_v30, %v2017_v0  ;;  %v2074_v23 = vadd.f32 %v2066_v3, %v2018_v34  ;;  %v2075_v9 = vsub.f32 1.0, %v2019_v52 }
 0x1af   : > { %v2076_v24 = vsub.f32 1.0, %v2020_v28  ;;  %v2077_v29 = vsub.f32 1.0, %v2021_v27  ;;  %v2078_v60 = vsub.f32 1.0, %v2022_v36  ;;  %v2079_v33 = vsub.f32 1.0, %v2023_v57 }
 0x1b0   : > { %v2080_v62 = vsub.f32 1.0, %v2024_v1  ;;  %v2081_v63 = vsub.f32 1.0, %v2025_v41  ;;  %v2082_v35 = vsub.f32 1.0, %v2026_v25  ;;  %v2083_v8 = vmul.f32 100000.0, %v2075_v9 }
 0x1b1   : > { %v2084_v32 = vmul.f32 100000.0, %v2076_v24  ;;  %v2085_v55 = vmul.f32 100000.0, %v2077_v29  ;;  %v2086_v56 = vmul.f32 100000.0, %v2078_v60  ;;  %v2087_v45 = vmul.f32 100000.0, %v2079_v33 }
 0x1b2   : > { %v2088_v12 = vmul.f32 100000.0, %v2080_v62  ;;  %v2089_v0 = vmul.f32 100000.0, %v2081_v63  ;;  %v2090_v34 = vmul.f32 100000.0, %v2082_v35  ;;  %v2091_v52 = vadd.f32 %v2083_v8, %v2067_v13 }
 0x1b3   : > { %v2092_v28 = vadd.f32 %v2084_v32, %v2068_v20  ;;  %v2093_v27 = vadd.f32 %v2085_v55, %v2069_v22  ;;  %v2094_v36 = vadd.f32 %v2086_v56, %v2070_v10  ;;  %v2095_v57 = vadd.f32 %v2087_v45, %v2071_v61 }
 0x1b4   : > { %v2096_v1 = vadd.f32 %v2088_v12, %v2072_v16  ;;  %v2097_v41 = vadd.f32 %v2089_v0, %v2073_v47  ;;  %v2098_v25 = vadd.f32 %v2090_v34, %v2074_v23  ;;  %2099 = vst [vmem:[%s406_s24] sm:$0xff] %v2091_v52  ;;  %v4687_v48 = vmax.f32 %v4530_v43, %v4565_v2 }
 0x1b5   : > { %2100 = vst [vmem:[%s406_s24 + $0x8] sm:$0xff] %v2092_v28  ;;  %2101 = vst [vmem:[%s406_s24 + $0x10] sm:$0xff] %v2093_v27  ;;  %v4691_v50 = vmax.f32 %v4535_v58, %v4569_v18  ;;  %v4695_v51 = vmax.f32 %v4540_v31, %v4573_v40  ;;  %v4699_v14 = vmax.f32 %v4545_v26, %v4577_v17  ;;  %v842_v31 = vrot.slane %v4656_v5, 4 }
 0x1b6   : > { %2102 = vst [vmem:[%s406_s24 + $0x18] sm:$0xff] %v2094_v36  ;;  %2103 = vst [vmem:[%s406_s24 + $0x20] sm:$0xff] %v2095_v57  ;;  %v4705_v43 = vmax.f32 %v4550_v37, %v4581_v42  ;;  %v4709_v58 = vmax.f32 %v4555_v44, %v4585_v7  ;;  %v848_v26 = vrot.slane %v4663_v15, 4 }
 0x1b7   : > { %2104 = vst [vmem:[%s406_s24 + $0x28] sm:$0xff] %v2096_v1  ;;  %2105 = vst [vmem:[%s406_s24 + $0x30] sm:$0xff] %v2097_v41 }
 0x1b8   : > { %2106 = vst [vmem:[%s406_s24 + $0x38] sm:$0xff] %v2098_v25  ;;  %s2687_s24 = sshll.u32 %s2824_s14, 4  ;;  %s2688_s24 = int_to_ptr.vmem [resolvable:$false] %s2687_s24 }
 0x1b9   : > { %s2689_s21 = scalar_lea.vmem %s2688_s24, 2048  ;;  %p2690_p1 = scmp.lt.s32.totalorder %s4678_s25, %s2688_s24 }
 0x1ba   : > { %p2691_p2 = scmp.lt.s32.totalorder %s2689_s21, %s2683_s11 }
 0x1bc   : > { %p2692_p3 = por %p2691_p2, %p2690_p1 }
 0x1be   : > { %p2693_p5 = pnand %p2692_p3, %p2686_p0 }
 0x1c0   : > { %2696 = shalt.err (!%p2693_p5)
}
 0x1c1   : > { %s2697_s19 = scalar_lea.hbm %s4676_s16, 1024  ;;  %s2701_s14 = scalar_lea.hbm %s4822_s7, 2048 }
 0x1c2   : > { %p2698_p6 = scmp.ne.s32.totalorder %s4676_s16, %s2697_s19  ;;  %p2702_p10 = scmp.lt.s32.totalorder %s4676_s16, %s4822_s7 }
 0x1c3   : > { %p2703_p11 = scmp.lt.s32.totalorder %s2701_s14, %s2697_s19 }
 0x1c4   : > { %p2699_p7 = pnand %p2698_p6, %p2915_p4 }
 0x1c5   : > { %p2704_p12 = por %p2703_p11, %p2702_p10 }
 0x1c6   : > { %p2700_p9 = pneg %p2699_p7 }
 0x1c8   : > { %p2705_p13 = pnand %p2704_p12, %p2700_p9 }
 0x1ca   : > { %2708 = shalt.err (!%p2705_p13)
}
 0x1cb   : > { %s5270_s11 = scalar_lea.sflag [#allocation5], %s4667_s22  ;;  %v854_v37 = vrot.slane %v4687_v48, 4  ;;  %v860_v44 = vrot.slane %v4691_v50, 4  ;;  %v866_v2 = vrot.slane %v4695_v51, 4  ;;  %v872_v18 = vrot.slane %v4699_v14, 4  ;;  %s2709_s0 = scalar_lea.vmem %s4701_s26, 1024 }
 0x1cc   : > { %2432 = dma.vmem_to_hbm [thread:$0]  (%p2915_p4), %s4678_s25, 1024, %s4676_s16, %s5270_s11   ;;  %v843_v40 = vmax.f32 %v4656_v5, %v842_v31  ;;  %v849_v17 = vmax.f32 %v4663_v15, %v848_v26  ;;  %v878_v42 = vrot.slane %v4705_v43, 4  ;;  %v884_v7 = vrot.slane %v4709_v58, 4 }
 0x1cd   : > { %p2710_p0 = scmp.ne.s32.totalorder %s4701_s26, %s2709_s0  ;;  %s2825_s1 = smov [#allocation6]  }
 0x1ce   : > { %s2713_s2 = sshll.u32 %s2825_s1, 4  ;;  %s2714_s2 = int_to_ptr.vmem [resolvable:$false] %s2713_s2 }
 0x1cf   : > { %p2711_p1 = pnand %p2710_p0, %p2915_p4  ;;  %s2715_s25 = scalar_lea.vmem %s2714_s2, 2048 }
 0x1d0   : > { %p2716_p3 = scmp.lt.s32.totalorder %s4701_s26, %s2714_s2  ;;  %p2717_p5 = scmp.lt.s32.totalorder %s2715_s25, %s2709_s0 }
 0x1d1   : > { %p2712_p2 = pneg %p2711_p1 }
 0x1d2   : > { %p2718_p6 = por %p2717_p5, %p2716_p3 }
 0x1d4   : > { %p2719_p7 = pnand %p2718_p6, %p2712_p2 }
 0x1d6   : > { %2722 = shalt.err (!%p2719_p7)
}
 0x1d7   : > { %s2723_s16 = scalar_lea.hbm %s4683_s20, 1024  ;;  %s2727_s21 = scalar_lea.hbm %s4823_s8, 2048 }
 0x1d8   : > { %p2724_p9 = scmp.ne.s32.totalorder %s4683_s20, %s2723_s16  ;;  %p2728_p12 = scmp.lt.s32.totalorder %s4683_s20, %s4823_s8 }
 0x1d9   : > { %p2729_p13 = scmp.lt.s32.totalorder %s2727_s21, %s2723_s16 }
 0x1da   : > { %p2725_p10 = pnand %p2724_p9, %p2915_p4 }
 0x1db   : > { %p2730_p0 = por %p2729_p13, %p2728_p12 }
 0x1dc   : > { %p2726_p11 = pneg %p2725_p10 }
 0x1de   : > { %p2731_p1 = pnand %p2730_p0, %p2726_p11 }
 0x1e0   : > { %2734 = shalt.err (!%p2731_p1)
}
 0x1e1   : > { %2433 = dma.vmem_to_hbm [thread:$0]  (%p2915_p4), %s4701_s26, 1024, %s4683_s20, %s5270_s11   ;;  %v855_v5 = vmax.f32 %v4687_v48, %v854_v37  ;;  %v861_v15 = vmax.f32 %v4691_v50, %v860_v44  ;;  %v867_v19 = vmax.f32 %v4695_v51, %v866_v2  ;;  %v873_v46 = vmax.f32 %v4699_v14, %v872_v18  ;;  %v5271_v1 = vld [vmem:[#allocation9_spill] sm:$0xff] }
 0x1e2   : > { %v844_v21 = vrot.slane %v843_v40, 2  ;;  %v850_v54 = vrot.slane %v849_v17, 2  ;;  %v879_v49 = vmax.f32 %v4705_v43, %v878_v42  ;;  %v885_v59 = vmax.f32 %v4709_v58, %v884_v7  ;;  %s2377_s22 = sshll.u32 %s3962_s12, 3  ;;  %s2428_s26 = sshll.u32 %s2807_s30, 7 }
 0x1e3   : > { %v856_v4 = vrot.slane %v855_v5, 2  ;;  %v862_v38 = vrot.slane %v861_v15, 2  ;;  %v868_v53 = vrot.slane %v867_v19, 2  ;;  %v874_v11 = vrot.slane %v873_v46, 2  ;;  %s399_s20 = scalar_lea.vmem [#allocation2], %s2377_s22  ;;  %s2132_s25 = scalar_lea.hbm %s4821_s6, %s2428_s26 }
 0x1e4   : > { %v845_v39 = vmax.f32 %v843_v40, %v844_v21  ;;  %v851_v6 = vmax.f32 %v849_v17, %v850_v54  ;;  %v880_v30 = vrot.slane %v879_v49, 2  ;;  %v886_v3 = vrot.slane %v885_v59, 2  ;;  %s2134_s0 = sshll.u32 %s399_s20, 4  ;;  %s2108_s16 = scalar_lea.sflag [#allocation3], %s3962_s12  ;;  %s2135_s0 = int_to_ptr.vmem [resolvable:$true] %s2134_s0 }
 0x1e5   : > { %v857_v13 = vmax.f32 %v855_v5, %v856_v4  ;;  %v863_v20 = vmax.f32 %v861_v15, %v862_v38  ;;  %v869_v22 = vmax.f32 %v867_v19, %v868_v53  ;;  %v875_v10 = vmax.f32 %v873_v46, %v874_v11  ;;  %s2735_s23 = scalar_lea.vmem %s2135_s0, 128  ;;  %s2827_s24 = smov [#allocation2]  }
 0x1e6   : > { %v846_v61 = vrot.slane %v845_v39, 1  ;;  %v852_v16 = vrot.slane %v851_v6, 1  ;;  %v881_v47 = vmax.f32 %v879_v49, %v880_v30  ;;  %v887_v23 = vmax.f32 %v885_v59, %v886_v3  ;;  %p2736_p2 = scmp.ne.s32.totalorder %s2135_s0, %s2735_s23  ;;  %s2739_s21 = sshll.u32 %s2827_s24, 4  ;;  %s2740_s21 = int_to_ptr.vmem [resolvable:$false] %s2739_s21 }
 0x1e7   : > { %v858_v9 = vrot.slane %v857_v13, 1  ;;  %v864_v24 = vrot.slane %v863_v20, 1  ;;  %v870_v29 = vrot.slane %v869_v22, 1  ;;  %v876_v60 = vrot.slane %v875_v10, 1  ;;  %s2741_s30 = scalar_lea.vmem %s2740_s21, 256  ;;  %p2742_p6 = scmp.lt.s32.totalorder %s2135_s0, %s2740_s21 }
 0x1e8   : > { %v847_v33 = vmax.f32 %v845_v39, %v846_v61  ;;  %v853_v62 = vmax.f32 %v851_v6, %v852_v16  ;;  %v882_v63 = vrot.slane %v881_v47, 1  ;;  %v888_v35 = vrot.slane %v887_v23, 1  ;;  %p2737_p3 = pnand %p2736_p2, %p2915_p4  ;;  %p2743_p7 = scmp.lt.s32.totalorder %s2741_s30, %s2735_s23 }
 0x1e9   : > { %v859_v8 = vmax.f32 %v857_v13, %v858_v9  ;;  %v865_v32 = vmax.f32 %v863_v20, %v864_v24  ;;  %v871_v55 = vmax.f32 %v869_v22, %v870_v29  ;;  %v877_v56 = vmax.f32 %v875_v10, %v876_v60 }
 0x1ea   : > { %v883_v45 = vmax.f32 %v881_v47, %v882_v63  ;;  %v889_v12 = vmax.f32 %v887_v23, %v888_v35  ;;  %v898_v0 = vcombine.low %v847_v33, %v853_v62  ;;  %v2826_v28 = vmov 1966171168   ;;  %p2738_p5 = pneg %p2737_p3  ;;  %p2744_p9 = por %p2743_p7, %p2742_p6 }
 0x1eb   : > { %v899_v34 = vcombine.low %v859_v8, %v865_v32  ;;  %v900_v52 = vcombine.low %v871_v55, %v877_v56  ;;  %v903_v27 = vunpack.c.l.s4 %v2826_v28 }
 0x1ec   : > { %v901_v36 = vcombine.low %v883_v45, %v889_v12  ;;  %p2745_p10 = pnand %p2744_p9, %p2738_p5 }
 0x1ed   : > { %v904_v57 = vunpack.c.0.s8 %v903_v27 }
 0x1ef   : > { %v907_v41 = vsub.s32 %v904_v57, %v5271_v1 }
 0x1f1   : > { %v908_v25 = vrot.slane %v898_v0, %v907_v41  ;;  %v915_v48 = vrot.slane %v899_v34, %v907_v41  ;;  %v922_v50 = vrot.slane %v900_v52, %v907_v41  ;;  %v929_v51 = vrot.slane %v901_v36, %v907_v41 }
 0x1f3   : > { %v930_v14 = vcombine.low %v908_v25, %v915_v48  ;;  %v931_v43 = vcombine.low %v922_v50, %v929_v51 }
 0x1f5   : > { %v938_v58 = vrot.slane %v930_v14, %v907_v41  ;;  %v945_v31 = vrot.slane %v931_v43, %v907_v41 }
 0x1f7   : > { %v946_v26 = vcombine.low %v938_v58, %v945_v31 }
 0x1f9   : > { %948 = vst [vmem:[%s399_s20] sm:$0xff] %v946_v26 }
 0x1fa   : > { %2748 = shalt.err (!%p2745_p10)
}
 0x1fb   : > { %s2749_s19 = scalar_lea.hbm %s2132_s25, 128  ;;  %s2753_s11 = scalar_lea.hbm %s4821_s6, 256 }
 0x1fc   : > { %p2750_p11 = scmp.ne.s32.totalorder %s2132_s25, %s2749_s19  ;;  %p2754_p0 = scmp.lt.s32.totalorder %s2132_s25, %s4821_s6 }
 0x1fd   : > { %p2755_p1 = scmp.lt.s32.totalorder %s2753_s11, %s2749_s19 }
 0x1fe   : > { %p2751_p12 = pnand %p2750_p11, %p2915_p4 }
 0x1ff   : > { %p2756_p2 = por %p2755_p1, %p2754_p0 }
 0x200   : > { %p2752_p13 = pneg %p2751_p12 }
 0x202   : > { %p2757_p3 = pnand %p2756_p2, %p2752_p13 }
 0x204   : > { %2760 = shalt.err (!%p2757_p3)
}
 0x205   : > { %2431 = dma.vmem_to_hbm [thread:$0]  (%p2915_p4), %s2135_s0, 128, %s2132_s25, %s2108_s16  }
 0x206 PF: > { %p2447_p5 = scmp.ge.s32.totalorder %s2815_s10, 2  ;;  %s2178_s20 = sand.u32 1, %s2795_s27  }
 0x207   : > { %s2179_s1 = scalar_lea.sflag [#allocation3], %s2178_s20 }
 0x208   : > { %p2438_p6 = pnand %p2447_p5, %p2924_p8 }
 0x20a   : > { %p2439_p7 = pneg %p2438_p6 }
 0x20c   : > { %2786 = dma.done.wait (%p2439_p7), %s2179_s1, 128  }
 0x20d   : > { %2788 = vsyncadd (%p2439_p7), %s2179_s1, 4294967168  ;;  %s5272_s2 = sadd.s32 4294967294, %s2815_s10  }
 0x20e   : > { %s2187_s23 = sand.u32 1, %s5272_s2  }
 0x20f   : > { %s2188_s24 = scalar_lea.sflag [#allocation5], %s2187_s23 }
 0x210   : > { %2790 = dma.done.wait (%p2439_p7), %s2188_s24, 2048  }
 0x211   : > { %2792 = vsyncadd (%p2439_p7), %s2188_s24, 4294965248  ;;  %s25_s10 = sadd.s32 1, %s2815_s10   ;;  %s5273_s27 = smov %s2799_s28 }
 0x212   : > { %p22_p4 = scmp.ge.s32.totalorder %s25_s10, 4   ;;  %s5274_s28 = smov %s2803_s29 }
 0x213   : > { %s5275_s29 = smov %s2930_s18  ;;  %s5276_s30 = smov %s2811_s9 }
 0x214   : > { %s5277_s9 = smov %s5279_s13  ;;  %24 = sbr.rel (!%p22_p4) target bundleno = 10 (0xa), region = 130 }
 0x219   :  { %2202 = vsyncpa [#allocation3], 1 }
 0x21a   :  { %2204 = vsyncpa [#allocation3 + $0x1], 1 }
 0x21b   :  { %2205 = vsyncpa [#allocation5], 1 }
 0x21c   :  { %2207 = vsyncpa [#allocation5 + $0x1], 1 }

</bundles_post_ra>
